<compile_context>
chip_gen: v7x
topology: tpu7x:2x2x1
jax: 0.10.0
libtpu: 0.0.40
codegen_flags: <defaults>
</compile_context>

<pallas_src>
import functools

import jax
import jax.numpy as jnp
from jax.experimental import pallas as pl
from jax.experimental.pallas import tpu as pltpu

# ----- small synthetic config (BERT-like) -----
VOCAB = 128
TYPE_VOCAB = 2
MAX_POS = 32
HIDDEN = 32
HEADS = 4
HEAD_DIM = HIDDEN // HEADS
INTER = 64
LAYERS = 2
EPS = 1e-12


# ---------------- in-kernel helpers ----------------

def _layernorm(x, g, b):
    mu = jnp.mean(x, axis=-1, keepdims=True)
    var = jnp.mean(jnp.square(x - mu), axis=-1, keepdims=True)
    return (x - mu) * jax.lax.rsqrt(var + EPS) * g + b


def _erf(x):
    # Abramowitz & Stegun 7.1.26 polynomial approximation of erf
    # (|err| < 1.5e-7): matches HF BERT's exact (erf) GELU closely while only
    # needing exp / mul / where (VPU + EUP ops on every TPU generation).
    p = jnp.float32(0.3275911)
    a1 = jnp.float32(0.254829592)
    a2 = jnp.float32(-0.284496736)
    a3 = jnp.float32(1.421413741)
    a4 = jnp.float32(-1.453152027)
    a5 = jnp.float32(1.061405429)
    sgn = jnp.where(x >= 0.0, jnp.float32(1.0), jnp.float32(-1.0))
    ax = jnp.abs(x)
    t = 1.0 / (1.0 + p * ax)
    poly = ((((a5 * t + a4) * t + a3) * t + a2) * t + a1) * t
    return sgn * (1.0 - poly * jnp.exp(-ax * ax))


def _gelu(x):
    # erf-based GELU (HF "gelu" exact), via the polynomial erf above.
    return 0.5 * x * (1.0 + _erf(x * jnp.float32(0.7071067811865476)))


# ---------------- the fused kernel ----------------

def _bert_encoder_kernel(tokens_ref, mask_ref,
                         emb_g_ref, emb_b_ref,
                         qkv_w_ref, qkv_b_ref,
                         ao_w_ref, ao_b_ref, ln1_g_ref, ln1_b_ref,
                         fi_w_ref, fi_b_ref, fo_w_ref, fo_b_ref,
                         ln2_g_ref, ln2_b_ref,
                         pool_w_ref, pool_b_ref,
                         hidden_ref, pooled_ref,
                         *, batch, seq):
    f32 = jnp.float32
    M = batch * seq

    # Attention mask, loaded/materialized ONCE at the exact shape it is added
    # at: (HEADS*B, S, S), head-major leading order.  No in-loop broadcasts.
    mask = mask_ref[...]

    # --- embedding LayerNorm ---
    h = _layernorm(tokens_ref[...], emb_g_ref[...], emb_b_ref[...])   # (M, H)

    for l in range(LAYERS):                                # static unroll
        # ---- fused QKV projection (1/sqrt(Dh) pre-folded into Q): 1 push ----
        qkv = (jnp.dot(h, qkv_w_ref[l], preferred_element_type=f32)
               + qkv_b_ref[l])                             # (M, 3H)

        # ---- fold heads into the leading axis: (HEADS*B, S, Dh) ----
        # Only layout-safe ops: lane slices, leading-dim reshapes (minor dim
        # kept at Dh) and one leading-axis concat per tensor.
        def fold(col0):
            parts = [
                qkv[:, col0 + hd * HEAD_DIM: col0 + (hd + 1) * HEAD_DIM]
                .reshape(batch, seq, HEAD_DIM)
                for hd in range(HEADS)
            ]
            return jnp.concatenate(parts, axis=0)          # (HEADS*B, S, Dh)

        q = fold(0)
        k = fold(HIDDEN)
        v = fold(2 * HIDDEN)

        # ---- all heads at once: 2 einsums + ONE fused softmax ----
        s = jnp.einsum('bqd,bkd->bqk', q, k,
                       preferred_element_type=f32) + mask  # (HEADS*B, S, S)
        m = jnp.max(s, axis=-1, keepdims=True)
        p = jnp.exp(s - m)
        p = p * pl.reciprocal(jnp.sum(p, axis=-1, keepdims=True), approx=True)
        ctx = jnp.einsum('bqk,bkd->bqd', p, v,
                         preferred_element_type=f32)       # (HEADS*B, S, Dh)

        # ---- output projection: one head-batched einsum, then head sum ----
        ctx_hm = (ctx.reshape(HEADS * M, HEAD_DIM)
                     .reshape(HEADS, M, HEAD_DIM))         # (HEADS, M, Dh)
        attn_h = jnp.einsum('hmd,hdo->hmo', ctx_hm, ao_w_ref[l],
                            preferred_element_type=f32)    # (HEADS, M, H)
        attn = attn_h[0]
        for hd in range(1, HEADS):
            attn = attn + attn_h[hd]
        attn = attn + ao_b_ref[l]
        h = _layernorm(attn + h, ln1_g_ref[l], ln1_b_ref[l])

        # ---- fused FFN: dense + GELU + dense + residual LayerNorm ----
        y = jnp.dot(h, fi_w_ref[l], preferred_element_type=f32) + fi_b_ref[l]
        y = _gelu(y)
        y = jnp.dot(y, fo_w_ref[l], preferred_element_type=f32) + fo_b_ref[l]
        h = _layernorm(y + h, ln2_g_ref[l], ln2_b_ref[l])

    hidden_ref[...] = h.astype(hidden_ref.dtype)

    # ---- pooler: ONE dot + tanh over all rows, pick the [CLS] rows ----
    pooled_all = jnp.tanh(jnp.dot(h, pool_w_ref[...],
                                  preferred_element_type=f32)
                          + pool_b_ref[...])               # (M, H)
    for b in range(batch):                                 # B row stores
        pooled_ref[b: b + 1, :] = pooled_all[b * seq: b * seq + 1, :].astype(
            pooled_ref.dtype)


def bert_encoder(tokens, mask_f, packed, *, batch, seq):
    M = batch * seq
    kernel = functools.partial(_bert_encoder_kernel, batch=batch, seq=seq)
    return pl.pallas_call(
        kernel,
        out_shape=(jax.ShapeDtypeStruct((M, HIDDEN), jnp.float32),
                   jax.ShapeDtypeStruct((batch, HIDDEN), jnp.float32)),
        compiler_params=pltpu.CompilerParams(vmem_limit_bytes=32 * 1024 * 1024),
    )(tokens, mask_f, *packed)


# ---------------- parameters ----------------

def _dense(key, fan_in, fan_out):
    kw, _ = jax.random.split(key)
    return {"w": 0.02 * jax.random.normal(kw, (fan_in, fan_out), jnp.float32),
            "b": jnp.zeros((fan_out,), jnp.float32)}


def init_params(key):
    keys = jax.random.split(key, 4 + LAYERS)
    params = {
        "word_emb": 0.02 * jax.random.normal(keys[0], (VOCAB, HIDDEN), jnp.float32),
        "pos_emb": 0.02 * jax.random.normal(keys[1], (MAX_POS, HIDDEN), jnp.float32),
        "type_emb": 0.02 * jax.random.normal(keys[2], (TYPE_VOCAB, HIDDEN), jnp.float32),
        "emb_ln_g": jnp.ones((HIDDEN,), jnp.float32),
        "emb_ln_b": jnp.zeros((HIDDEN,), jnp.float32),
        "pooler": _dense(keys[3], HIDDEN, HIDDEN),
        "layers": [],
    }
    for l in range(LAYERS):
        lk = jax.random.split(keys[4 + l], 6)
        params["layers"].append({
            "q": _dense(lk[0], HIDDEN, HIDDEN),
            "k": _dense(lk[1], HIDDEN, HIDDEN),
            "v": _dense(lk[2], HIDDEN, HIDDEN),
            "attn_out": _dense(lk[3], HIDDEN, HIDDEN),
            "attn_ln_g": jnp.ones((HIDDEN,), jnp.float32),
            "attn_ln_b": jnp.zeros((HIDDEN,), jnp.float32),
            "ffn_in": _dense(lk[4], HIDDEN, INTER),
            "ffn_out": _dense(lk[5], INTER, HIDDEN),
            "ffn_ln_g": jnp.ones((HIDDEN,), jnp.float32),
            "ffn_ln_b": jnp.zeros((HIDDEN,), jnp.float32),
        })
    return params


def pack_params(params):
    """Stack per-layer weights, fuse QKV, fold 1/sqrt(Dh) into Q,
    reshape the attention output weight to (HEADS, Dh, H)."""
    scale = jnp.float32(1.0 / (HEAD_DIM ** 0.5))
    qkv_w, qkv_b = [], []
    ao_w, ao_b, ln1_g, ln1_b = [], [], [], []
    fi_w, fi_b, fo_w, fo_b = [], [], [], []
    ln2_g, ln2_b = [], []
    for lp in params["layers"]:
        qkv_w.append(jnp.concatenate(
            [lp["q"]["w"] * scale, lp["k"]["w"], lp["v"]["w"]], axis=1))
        qkv_b.append(jnp.concatenate(
            [lp["q"]["b"] * scale, lp["k"]["b"], lp["v"]["b"]], axis=0)[None, :])
        # (H, H) -> (HEADS, Dh, H): rows are head-major, so this is a pure view.
        ao_w.append(lp["attn_out"]["w"].reshape(HEADS, HEAD_DIM, HIDDEN))
        ao_b.append(lp["attn_out"]["b"][None, :])
        ln1_g.append(lp["attn_ln_g"][None, :])
        ln1_b.append(lp["attn_ln_b"][None, :])
        fi_w.append(lp["ffn_in"]["w"])
        fi_b.append(lp["ffn_in"]["b"][None, :])
        fo_w.append(lp["ffn_out"]["w"])
        fo_b.append(lp["ffn_out"]["b"][None, :])
        ln2_g.append(lp["ffn_ln_g"][None, :])
        ln2_b.append(lp["ffn_ln_b"][None, :])
    stack = lambda xs: jnp.stack(xs, axis=0)
    return (params["emb_ln_g"][None, :], params["emb_ln_b"][None, :],
            stack(qkv_w), stack(qkv_b),
            stack(ao_w), stack(ao_b), stack(ln1_g), stack(ln1_b),
            stack(fi_w), stack(fi_b), stack(fo_w), stack(fo_b),
            stack(ln2_g), stack(ln2_b),
            params["pooler"]["w"], params["pooler"]["b"][None, :])


# ---------------- forward ----------------

def bert_forward(params, input_ids, token_type_ids, attention_mask,
                 return_global_token=True):
    B, S = input_ids.shape
    H = HIDDEN

    # --- embeddings: word + position + token_type (plain-JAX gathers) ---
    pos_ids = jnp.arange(S)
    emb = (jnp.take(params["word_emb"], input_ids, axis=0)
           + params["pos_emb"][pos_ids][None, :, :]
           + jnp.take(params["type_emb"], token_type_ids, axis=0))
    tokens = emb.reshape(B * S, H).astype(jnp.float32)

    # Additive attention mask, pre-materialized at the in-kernel score shape
    # (HEADS*B, S, S) with head-major leading order (matches the kernel fold).
    add_mask = ((1.0 - attention_mask.astype(jnp.float32)) * -10000.0)  # (B, S)
    mask_f = jnp.tile(add_mask[None, :, None, :], (HEADS, 1, S, 1))     # (HEADS,B,S,S)
    mask_f = mask_f.reshape(HEADS * B, S, S)

    packed = pack_params(params)
    hidden_flat, pooled = bert_encoder(tokens, mask_f, packed, batch=B, seq=S)

    last_hidden = hidden_flat.reshape(B, S, H)
    # PyTorch module drops the [CLS] position from the hidden states.
    hidden_states = last_hidden[:, 1:]
    if return_global_token:
        return hidden_states, pooled
    return hidden_states


if __name__ == "__main__":
    key = jax.random.PRNGKey(0)
    pkey, dkey = jax.random.split(key)
    params = init_params(pkey)

    B, S = 2, 8
    input_ids = jax.random.randint(dkey, (B, S), 0, VOCAB, dtype=jnp.int32)
    token_type_ids = jnp.zeros((B, S), jnp.int32)
    attention_mask = jnp.ones((B, S), jnp.int32)

    hidden_states, pooled = bert_forward(params, input_ids, token_type_ids,
                                         attention_mask, return_global_token=True)
    jax.block_until_ready((hidden_states, pooled))

    assert hidden_states.shape == (B, S - 1, HIDDEN)
    assert pooled.shape == (B, HIDDEN)
    assert bool(jnp.all(jnp.isfinite(hidden_states))) and bool(jnp.all(jnp.isfinite(pooled)))
    print("KERNEL_OK")
</pallas_src>

<mosaic_0001>
module attributes {stable_mosaic.version = 11 : i64} {
  func.func @_bert_encoder_kernel(%arg0: memref<16x32xf32, #tpu.memory_space<vmem>>, %arg1: memref<8x8x8xf32, #tpu.memory_space<vmem>>, %arg2: memref<1x32xf32, #tpu.memory_space<vmem>>, %arg3: memref<1x32xf32, #tpu.memory_space<vmem>>, %arg4: memref<2x32x96xf32, #tpu.memory_space<vmem>>, %arg5: memref<2x1x96xf32, #tpu.memory_space<vmem>>, %arg6: memref<2x4x8x32xf32, #tpu.memory_space<vmem>>, %arg7: memref<2x1x32xf32, #tpu.memory_space<vmem>>, %arg8: memref<2x1x32xf32, #tpu.memory_space<vmem>>, %arg9: memref<2x1x32xf32, #tpu.memory_space<vmem>>, %arg10: memref<2x32x64xf32, #tpu.memory_space<vmem>>, %arg11: memref<2x1x64xf32, #tpu.memory_space<vmem>>, %arg12: memref<2x64x32xf32, #tpu.memory_space<vmem>>, %arg13: memref<2x1x32xf32, #tpu.memory_space<vmem>>, %arg14: memref<2x1x32xf32, #tpu.memory_space<vmem>>, %arg15: memref<2x1x32xf32, #tpu.memory_space<vmem>>, %arg16: memref<32x32xf32, #tpu.memory_space<vmem>>, %arg17: memref<1x32xf32, #tpu.memory_space<vmem>>, %arg18: memref<16x32xf32, #tpu.memory_space<vmem>>, %arg19: memref<2x32xf32, #tpu.memory_space<vmem>>) attributes {dimension_semantics = [], scalar_prefetch = 0 : i64, scratch_operands = 0 : i64, tpu.core_type = #tpu.core_type<tc>} {
    %c0 = arith.constant 0 : index
    %c0_0 = arith.constant 0 : index
    %c0_1 = arith.constant 0 : index
    %0 = vector.load %arg1[%c0, %c0_0, %c0_1] : memref<8x8x8xf32, #tpu.memory_space<vmem>>, vector<8x8x8xf32>
    %c0_2 = arith.constant 0 : index
    %c0_3 = arith.constant 0 : index
    %1 = vector.load %arg0[%c0_2, %c0_3] : memref<16x32xf32, #tpu.memory_space<vmem>>, vector<16x32xf32>
    %c0_4 = arith.constant 0 : index
    %c0_5 = arith.constant 0 : index
    %2 = vector.load %arg2[%c0_4, %c0_5] : memref<1x32xf32, #tpu.memory_space<vmem>>, vector<1x32xf32>
    %c0_6 = arith.constant 0 : index
    %c0_7 = arith.constant 0 : index
    %3 = vector.load %arg3[%c0_6, %c0_7] : memref<1x32xf32, #tpu.memory_space<vmem>>, vector<1x32xf32>
    %cst = arith.constant dense<0.000000e+00> : vector<16xf32>
    %4 = vector.multi_reduction <add>, %1, %cst [1] : vector<16x32xf32> to vector<16xf32>
    %5 = vector.shape_cast %4 : vector<16xf32> to vector<16x1xf32>
    %cst_8 = arith.constant 3.200000e+01 : f32
    %6 = vector.broadcast %cst_8 : f32 to vector<16x1xf32>
    %7 = arith.divf %5, %6 : vector<16x1xf32>
    %8 = vector.broadcast %7 : vector<16x1xf32> to vector<16x32xf32>
    %9 = arith.subf %1, %8 : vector<16x32xf32>
    %10 = arith.mulf %9, %9 : vector<16x32xf32>
    %cst_9 = arith.constant dense<0.000000e+00> : vector<16xf32>
    %11 = vector.multi_reduction <add>, %10, %cst_9 [1] : vector<16x32xf32> to vector<16xf32>
    %12 = vector.shape_cast %11 : vector<16xf32> to vector<16x1xf32>
    %cst_10 = arith.constant 3.200000e+01 : f32
    %13 = vector.broadcast %cst_10 : f32 to vector<16x1xf32>
    %14 = arith.divf %12, %13 : vector<16x1xf32>
    %15 = vector.broadcast %7 : vector<16x1xf32> to vector<16x32xf32>
    %16 = arith.subf %1, %15 : vector<16x32xf32>
    %cst_11 = arith.constant 9.99999996E-13 : f32
    %17 = vector.broadcast %cst_11 : f32 to vector<16x1xf32>
    %18 = arith.addf %14, %17 : vector<16x1xf32>
    %19 = math.rsqrt %18 : vector<16x1xf32>
    %20 = vector.broadcast %19 : vector<16x1xf32> to vector<16x32xf32>
    %21 = arith.mulf %16, %20 : vector<16x32xf32>
    %22 = vector.broadcast %2 : vector<1x32xf32> to vector<16x32xf32>
    %23 = arith.mulf %21, %22 : vector<16x32xf32>
    %24 = vector.broadcast %3 : vector<1x32xf32> to vector<16x32xf32>
    %25 = arith.addf %23, %24 : vector<16x32xf32>
    %c0_12 = arith.constant 0 : index
    %c0_13 = arith.constant 0 : index
    %c0_14 = arith.constant 0 : index
    %26 = vector.load %arg4[%c0_12, %c0_13, %c0_14] : memref<2x32x96xf32, #tpu.memory_space<vmem>>, vector<1x32x96xf32>
    %27 = vector.shape_cast %26 : vector<1x32x96xf32> to vector<32x96xf32>
    %cst_15 = arith.constant dense<0.000000e+00> : vector<16x96xf32>
    %28 = tpu.matmul %25, %27, %cst_15 {dimension_numbers = #tpu.dot_dimension_numbers<[1], [0], [0], [1], [0, 0, 1, 1], [], []>} : vector<16x32xf32>, vector<32x96xf32>, vector<16x96xf32> -> vector<16x96xf32>
    %c0_16 = arith.constant 0 : index
    %c0_17 = arith.constant 0 : index
    %c0_18 = arith.constant 0 : index
    %29 = vector.load %arg5[%c0_16, %c0_17, %c0_18] : memref<2x1x96xf32, #tpu.memory_space<vmem>>, vector<1x1x96xf32>
    %30 = vector.shape_cast %29 : vector<1x1x96xf32> to vector<1x96xf32>
    %31 = vector.broadcast %30 : vector<1x96xf32> to vector<16x96xf32>
    %32 = arith.addf %28, %31 : vector<16x96xf32>
    %33 = vector.extract_strided_slice %32 {offsets = [0, 0], sizes = [16, 8], strides = [1, 1]} : vector<16x96xf32> to vector<16x8xf32>
    %34 = vector.shape_cast %33 : vector<16x8xf32> to vector<2x8x8xf32>
    %35 = vector.extract_strided_slice %32 {offsets = [0, 8], sizes = [16, 8], strides = [1, 1]} : vector<16x96xf32> to vector<16x8xf32>
    %36 = vector.shape_cast %35 : vector<16x8xf32> to vector<2x8x8xf32>
    %37 = vector.extract_strided_slice %32 {offsets = [0, 16], sizes = [16, 8], strides = [1, 1]} : vector<16x96xf32> to vector<16x8xf32>
    %38 = vector.shape_cast %37 : vector<16x8xf32> to vector<2x8x8xf32>
    %39 = vector.extract_strided_slice %32 {offsets = [0, 24], sizes = [16, 8], strides = [1, 1]} : vector<16x96xf32> to vector<16x8xf32>
    %40 = vector.shape_cast %39 : vector<16x8xf32> to vector<2x8x8xf32>
    %41 = tpu.concatenate %34, %36, %38, %40 in 0 : vector<2x8x8xf32>, vector<2x8x8xf32>, vector<2x8x8xf32>, vector<2x8x8xf32> -> vector<8x8x8xf32>
    %42 = vector.extract_strided_slice %32 {offsets = [0, 32], sizes = [16, 8], strides = [1, 1]} : vector<16x96xf32> to vector<16x8xf32>
    %43 = vector.shape_cast %42 : vector<16x8xf32> to vector<2x8x8xf32>
    %44 = vector.extract_strided_slice %32 {offsets = [0, 40], sizes = [16, 8], strides = [1, 1]} : vector<16x96xf32> to vector<16x8xf32>
    %45 = vector.shape_cast %44 : vector<16x8xf32> to vector<2x8x8xf32>
    %46 = vector.extract_strided_slice %32 {offsets = [0, 48], sizes = [16, 8], strides = [1, 1]} : vector<16x96xf32> to vector<16x8xf32>
    %47 = vector.shape_cast %46 : vector<16x8xf32> to vector<2x8x8xf32>
    %48 = vector.extract_strided_slice %32 {offsets = [0, 56], sizes = [16, 8], strides = [1, 1]} : vector<16x96xf32> to vector<16x8xf32>
    %49 = vector.shape_cast %48 : vector<16x8xf32> to vector<2x8x8xf32>
    %50 = tpu.concatenate %43, %45, %47, %49 in 0 : vector<2x8x8xf32>, vector<2x8x8xf32>, vector<2x8x8xf32>, vector<2x8x8xf32> -> vector<8x8x8xf32>
    %51 = vector.extract_strided_slice %32 {offsets = [0, 64], sizes = [16, 8], strides = [1, 1]} : vector<16x96xf32> to vector<16x8xf32>
    %52 = vector.shape_cast %51 : vector<16x8xf32> to vector<2x8x8xf32>
    %53 = vector.extract_strided_slice %32 {offsets = [0, 72], sizes = [16, 8], strides = [1, 1]} : vector<16x96xf32> to vector<16x8xf32>
    %54 = vector.shape_cast %53 : vector<16x8xf32> to vector<2x8x8xf32>
    %55 = vector.extract_strided_slice %32 {offsets = [0, 80], sizes = [16, 8], strides = [1, 1]} : vector<16x96xf32> to vector<16x8xf32>
    %56 = vector.shape_cast %55 : vector<16x8xf32> to vector<2x8x8xf32>
    %57 = vector.extract_strided_slice %32 {offsets = [0, 88], sizes = [16, 8], strides = [1, 1]} : vector<16x96xf32> to vector<16x8xf32>
    %58 = vector.shape_cast %57 : vector<16x8xf32> to vector<2x8x8xf32>
    %59 = tpu.concatenate %52, %54, %56, %58 in 0 : vector<2x8x8xf32>, vector<2x8x8xf32>, vector<2x8x8xf32>, vector<2x8x8xf32> -> vector<8x8x8xf32>
    "tpu.trace_start"() <{level = 10 : i32, message = "bqd,bkd->bqk"}> : () -> ()
    %cst_19 = arith.constant dense<0.000000e+00> : vector<8x8x8xf32>
    %60 = tpu.matmul %41, %50, %cst_19 {dimension_numbers = #tpu.dot_dimension_numbers<[2], [2], [1], [1], [0, 0, 0, 1, 1, 1], [0], [0]>} : vector<8x8x8xf32>, vector<8x8x8xf32>, vector<8x8x8xf32> -> vector<8x8x8xf32>
    "tpu.trace_stop"() : () -> ()
    %61 = arith.addf %60, %0 : vector<8x8x8xf32>
    %cst_20 = arith.constant dense<0xFF800000> : vector<8x8xf32>
    %62 = vector.multi_reduction <maximumf>, %61, %cst_20 [2] : vector<8x8x8xf32> to vector<8x8xf32>
    %63 = vector.shape_cast %62 : vector<8x8xf32> to vector<8x8x1xf32>
    %64 = vector.broadcast %63 : vector<8x8x1xf32> to vector<8x8x8xf32>
    %65 = arith.subf %61, %64 : vector<8x8x8xf32>
    %66 = math.exp %65 : vector<8x8x8xf32>
    %cst_21 = arith.constant dense<0.000000e+00> : vector<8x8xf32>
    %67 = vector.multi_reduction <add>, %66, %cst_21 [2] : vector<8x8x8xf32> to vector<8x8xf32>
    %68 = vector.shape_cast %67 : vector<8x8xf32> to vector<8x8x1xf32>
    %69 = tpu.reciprocal %68 {approx = true} : vector<8x8x1xf32> -> vector<8x8x1xf32>
    %70 = vector.broadcast %69 : vector<8x8x1xf32> to vector<8x8x8xf32>
    %71 = arith.mulf %66, %70 : vector<8x8x8xf32>
    "tpu.trace_start"() <{level = 10 : i32, message = "bqk,bkd->bqd"}> : () -> ()
    %cst_22 = arith.constant dense<0.000000e+00> : vector<8x8x8xf32>
    %72 = tpu.matmul %71, %59, %cst_22 {dimension_numbers = #tpu.dot_dimension_numbers<[2], [1], [1], [2], [0, 0, 0, 1, 1, 2], [0], [0]>} : vector<8x8x8xf32>, vector<8x8x8xf32>, vector<8x8x8xf32> -> vector<8x8x8xf32>
    "tpu.trace_stop"() : () -> ()
    %73 = vector.shape_cast %72 : vector<8x8x8xf32> to vector<64x8xf32>
    %74 = vector.shape_cast %73 : vector<64x8xf32> to vector<4x16x8xf32>
    %c0_23 = arith.constant 0 : index
    %c0_24 = arith.constant 0 : index
    %c0_25 = arith.constant 0 : index
    %c0_26 = arith.constant 0 : index
    %75 = vector.load %arg6[%c0_23, %c0_24, %c0_25, %c0_26] : memref<2x4x8x32xf32, #tpu.memory_space<vmem>>, vector<1x4x8x32xf32>
    %76 = vector.shape_cast %75 : vector<1x4x8x32xf32> to vector<4x8x32xf32>
    "tpu.trace_start"() <{level = 10 : i32, message = "hmd,hdo->hmo"}> : () -> ()
    %cst_27 = arith.constant dense<0.000000e+00> : vector<4x16x32xf32>
    %77 = tpu.matmul %74, %76, %cst_27 {dimension_numbers = #tpu.dot_dimension_numbers<[2], [1], [1], [2], [0, 0, 0, 1, 1, 2], [0], [0]>} : vector<4x16x8xf32>, vector<4x8x32xf32>, vector<4x16x32xf32> -> vector<4x16x32xf32>
    "tpu.trace_stop"() : () -> ()
    %78 = vector.extract_strided_slice %77 {offsets = [0, 0, 0], sizes = [1, 16, 32], strides = [1, 1, 1]} : vector<4x16x32xf32> to vector<1x16x32xf32>
    %79 = vector.shape_cast %78 : vector<1x16x32xf32> to vector<16x32xf32>
    %80 = vector.extract_strided_slice %77 {offsets = [1, 0, 0], sizes = [1, 16, 32], strides = [1, 1, 1]} : vector<4x16x32xf32> to vector<1x16x32xf32>
    %81 = vector.shape_cast %80 : vector<1x16x32xf32> to vector<16x32xf32>
    %82 = arith.addf %79, %81 : vector<16x32xf32>
    %83 = vector.extract_strided_slice %77 {offsets = [2, 0, 0], sizes = [1, 16, 32], strides = [1, 1, 1]} : vector<4x16x32xf32> to vector<1x16x32xf32>
    %84 = vector.shape_cast %83 : vector<1x16x32xf32> to vector<16x32xf32>
    %85 = arith.addf %82, %84 : vector<16x32xf32>
    %86 = vector.extract_strided_slice %77 {offsets = [3, 0, 0], sizes = [1, 16, 32], strides = [1, 1, 1]} : vector<4x16x32xf32> to vector<1x16x32xf32>
    %87 = vector.shape_cast %86 : vector<1x16x32xf32> to vector<16x32xf32>
    %88 = arith.addf %85, %87 : vector<16x32xf32>
    %c0_28 = arith.constant 0 : index
    %c0_29 = arith.constant 0 : index
    %c0_30 = arith.constant 0 : index
    %89 = vector.load %arg7[%c0_28, %c0_29, %c0_30] : memref<2x1x32xf32, #tpu.memory_space<vmem>>, vector<1x1x32xf32>
    %90 = vector.shape_cast %89 : vector<1x1x32xf32> to vector<1x32xf32>
    %91 = vector.broadcast %90 : vector<1x32xf32> to vector<16x32xf32>
    %92 = arith.addf %88, %91 : vector<16x32xf32>
    %93 = arith.addf %92, %25 : vector<16x32xf32>
    %c0_31 = arith.constant 0 : index
    %c0_32 = arith.constant 0 : index
    %c0_33 = arith.constant 0 : index
    %94 = vector.load %arg8[%c0_31, %c0_32, %c0_33] : memref<2x1x32xf32, #tpu.memory_space<vmem>>, vector<1x1x32xf32>
    %95 = vector.shape_cast %94 : vector<1x1x32xf32> to vector<1x32xf32>
    %c0_34 = arith.constant 0 : index
    %c0_35 = arith.constant 0 : index
    %c0_36 = arith.constant 0 : index
    %96 = vector.load %arg9[%c0_34, %c0_35, %c0_36] : memref<2x1x32xf32, #tpu.memory_space<vmem>>, vector<1x1x32xf32>
    %97 = vector.shape_cast %96 : vector<1x1x32xf32> to vector<1x32xf32>
    %cst_37 = arith.constant dense<0.000000e+00> : vector<16xf32>
    %98 = vector.multi_reduction <add>, %93, %cst_37 [1] : vector<16x32xf32> to vector<16xf32>
    %99 = vector.shape_cast %98 : vector<16xf32> to vector<16x1xf32>
    %cst_38 = arith.constant 3.200000e+01 : f32
    %100 = vector.broadcast %cst_38 : f32 to vector<16x1xf32>
    %101 = arith.divf %99, %100 : vector<16x1xf32>
    %102 = vector.broadcast %101 : vector<16x1xf32> to vector<16x32xf32>
    %103 = arith.subf %93, %102 : vector<16x32xf32>
    %104 = arith.mulf %103, %103 : vector<16x32xf32>
    %cst_39 = arith.constant dense<0.000000e+00> : vector<16xf32>
    %105 = vector.multi_reduction <add>, %104, %cst_39 [1] : vector<16x32xf32> to vector<16xf32>
    %106 = vector.shape_cast %105 : vector<16xf32> to vector<16x1xf32>
    %cst_40 = arith.constant 3.200000e+01 : f32
    %107 = vector.broadcast %cst_40 : f32 to vector<16x1xf32>
    %108 = arith.divf %106, %107 : vector<16x1xf32>
    %109 = vector.broadcast %101 : vector<16x1xf32> to vector<16x32xf32>
    %110 = arith.subf %93, %109 : vector<16x32xf32>
    %cst_41 = arith.constant 9.99999996E-13 : f32
    %111 = vector.broadcast %cst_41 : f32 to vector<16x1xf32>
    %112 = arith.addf %108, %111 : vector<16x1xf32>
    %113 = math.rsqrt %112 : vector<16x1xf32>
    %114 = vector.broadcast %113 : vector<16x1xf32> to vector<16x32xf32>
    %115 = arith.mulf %110, %114 : vector<16x32xf32>
    %116 = vector.broadcast %95 : vector<1x32xf32> to vector<16x32xf32>
    %117 = arith.mulf %115, %116 : vector<16x32xf32>
    %118 = vector.broadcast %97 : vector<1x32xf32> to vector<16x32xf32>
    %119 = arith.addf %117, %118 : vector<16x32xf32>
    %c0_42 = arith.constant 0 : index
    %c0_43 = arith.constant 0 : index
    %c0_44 = arith.constant 0 : index
    %120 = vector.load %arg10[%c0_42, %c0_43, %c0_44] : memref<2x32x64xf32, #tpu.memory_space<vmem>>, vector<1x32x64xf32>
    %121 = vector.shape_cast %120 : vector<1x32x64xf32> to vector<32x64xf32>
    %cst_45 = arith.constant dense<0.000000e+00> : vector<16x64xf32>
    %122 = tpu.matmul %119, %121, %cst_45 {dimension_numbers = #tpu.dot_dimension_numbers<[1], [0], [0], [1], [0, 0, 1, 1], [], []>} : vector<16x32xf32>, vector<32x64xf32>, vector<16x64xf32> -> vector<16x64xf32>
    %c0_46 = arith.constant 0 : index
    %c0_47 = arith.constant 0 : index
    %c0_48 = arith.constant 0 : index
    %123 = vector.load %arg11[%c0_46, %c0_47, %c0_48] : memref<2x1x64xf32, #tpu.memory_space<vmem>>, vector<1x1x64xf32>
    %124 = vector.shape_cast %123 : vector<1x1x64xf32> to vector<1x64xf32>
    %125 = vector.broadcast %124 : vector<1x64xf32> to vector<16x64xf32>
    %126 = arith.addf %122, %125 : vector<16x64xf32>
    %cst_49 = arith.constant 5.000000e-01 : f32
    %127 = vector.broadcast %cst_49 : f32 to vector<16x64xf32>
    %128 = arith.mulf %127, %126 : vector<16x64xf32>
    %cst_50 = arith.constant 0.707106769 : f32
    %129 = vector.broadcast %cst_50 : f32 to vector<16x64xf32>
    %130 = arith.mulf %126, %129 : vector<16x64xf32>
    %cst_51 = arith.constant 0.000000e+00 : f32
    %131 = vector.broadcast %cst_51 : f32 to vector<16x64xf32>
    %132 = arith.cmpf oge, %130, %131 : vector<16x64xf32>
    %cst_52 = arith.constant 1.000000e+00 : f32
    %cst_53 = arith.constant -1.000000e+00 : f32
    %133 = vector.broadcast %cst_52 : f32 to vector<16x64xf32>
    %134 = vector.broadcast %cst_53 : f32 to vector<16x64xf32>
    %135 = arith.select %132, %133, %134 : vector<16x64xi1>, vector<16x64xf32>
    %136 = math.absf %130 : vector<16x64xf32>
    %cst_54 = arith.constant 0.327591091 : f32
    %137 = vector.broadcast %cst_54 : f32 to vector<16x64xf32>
    %138 = arith.mulf %137, %136 : vector<16x64xf32>
    %cst_55 = arith.constant 1.000000e+00 : f32
    %139 = vector.broadcast %cst_55 : f32 to vector<16x64xf32>
    %140 = arith.addf %139, %138 : vector<16x64xf32>
    %cst_56 = arith.constant 1.000000e+00 : f32
    %141 = vector.broadcast %cst_56 : f32 to vector<16x64xf32>
    %142 = arith.divf %141, %140 : vector<16x64xf32>
    %cst_57 = arith.constant 1.06140542 : f32
    %143 = vector.broadcast %cst_57 : f32 to vector<16x64xf32>
    %144 = arith.mulf %143, %142 : vector<16x64xf32>
    %cst_58 = arith.constant -1.45315206 : f32
    %145 = vector.broadcast %cst_58 : f32 to vector<16x64xf32>
    %146 = arith.addf %144, %145 : vector<16x64xf32>
    %147 = arith.mulf %146, %142 : vector<16x64xf32>
    %cst_59 = arith.constant 1.42141378 : f32
    %148 = vector.broadcast %cst_59 : f32 to vector<16x64xf32>
    %149 = arith.addf %147, %148 : vector<16x64xf32>
    %150 = arith.mulf %149, %142 : vector<16x64xf32>
    %cst_60 = arith.constant -0.284496725 : f32
    %151 = vector.broadcast %cst_60 : f32 to vector<16x64xf32>
    %152 = arith.addf %150, %151 : vector<16x64xf32>
    %153 = arith.mulf %152, %142 : vector<16x64xf32>
    %cst_61 = arith.constant 0.254829586 : f32
    %154 = vector.broadcast %cst_61 : f32 to vector<16x64xf32>
    %155 = arith.addf %153, %154 : vector<16x64xf32>
    %156 = arith.mulf %155, %142 : vector<16x64xf32>
    %cst_62 = arith.constant 0.000000e+00 : f32
    %157 = vector.broadcast %cst_62 : f32 to vector<16x64xf32>
    %158 = arith.subf %157, %136 : vector<16x64xf32>
    %159 = arith.mulf %158, %136 : vector<16x64xf32>
    %160 = math.exp %159 : vector<16x64xf32>
    %161 = arith.mulf %156, %160 : vector<16x64xf32>
    %cst_63 = arith.constant 1.000000e+00 : f32
    %162 = vector.broadcast %cst_63 : f32 to vector<16x64xf32>
    %163 = arith.subf %162, %161 : vector<16x64xf32>
    %164 = arith.mulf %135, %163 : vector<16x64xf32>
    %cst_64 = arith.constant 1.000000e+00 : f32
    %165 = vector.broadcast %cst_64 : f32 to vector<16x64xf32>
    %166 = arith.addf %165, %164 : vector<16x64xf32>
    %167 = arith.mulf %128, %166 : vector<16x64xf32>
    %c0_65 = arith.constant 0 : index
    %c0_66 = arith.constant 0 : index
    %c0_67 = arith.constant 0 : index
    %168 = vector.load %arg12[%c0_65, %c0_66, %c0_67] : memref<2x64x32xf32, #tpu.memory_space<vmem>>, vector<1x64x32xf32>
    %169 = vector.shape_cast %168 : vector<1x64x32xf32> to vector<64x32xf32>
    %cst_68 = arith.constant dense<0.000000e+00> : vector<16x32xf32>
    %170 = tpu.matmul %167, %169, %cst_68 {dimension_numbers = #tpu.dot_dimension_numbers<[1], [0], [0], [1], [0, 0, 1, 1], [], []>} : vector<16x64xf32>, vector<64x32xf32>, vector<16x32xf32> -> vector<16x32xf32>
    %c0_69 = arith.constant 0 : index
    %c0_70 = arith.constant 0 : index
    %c0_71 = arith.constant 0 : index
    %171 = vector.load %arg13[%c0_69, %c0_70, %c0_71] : memref<2x1x32xf32, #tpu.memory_space<vmem>>, vector<1x1x32xf32>
    %172 = vector.shape_cast %171 : vector<1x1x32xf32> to vector<1x32xf32>
    %173 = vector.broadcast %172 : vector<1x32xf32> to vector<16x32xf32>
    %174 = arith.addf %170, %173 : vector<16x32xf32>
    %175 = arith.addf %174, %119 : vector<16x32xf32>
    %c0_72 = arith.constant 0 : index
    %c0_73 = arith.constant 0 : index
    %c0_74 = arith.constant 0 : index
    %176 = vector.load %arg14[%c0_72, %c0_73, %c0_74] : memref<2x1x32xf32, #tpu.memory_space<vmem>>, vector<1x1x32xf32>
    %177 = vector.shape_cast %176 : vector<1x1x32xf32> to vector<1x32xf32>
    %c0_75 = arith.constant 0 : index
    %c0_76 = arith.constant 0 : index
    %c0_77 = arith.constant 0 : index
    %178 = vector.load %arg15[%c0_75, %c0_76, %c0_77] : memref<2x1x32xf32, #tpu.memory_space<vmem>>, vector<1x1x32xf32>
    %179 = vector.shape_cast %178 : vector<1x1x32xf32> to vector<1x32xf32>
    %cst_78 = arith.constant dense<0.000000e+00> : vector<16xf32>
    %180 = vector.multi_reduction <add>, %175, %cst_78 [1] : vector<16x32xf32> to vector<16xf32>
    %181 = vector.shape_cast %180 : vector<16xf32> to vector<16x1xf32>
    %cst_79 = arith.constant 3.200000e+01 : f32
    %182 = vector.broadcast %cst_79 : f32 to vector<16x1xf32>
    %183 = arith.divf %181, %182 : vector<16x1xf32>
    %184 = vector.broadcast %183 : vector<16x1xf32> to vector<16x32xf32>
    %185 = arith.subf %175, %184 : vector<16x32xf32>
    %186 = arith.mulf %185, %185 : vector<16x32xf32>
    %cst_80 = arith.constant dense<0.000000e+00> : vector<16xf32>
    %187 = vector.multi_reduction <add>, %186, %cst_80 [1] : vector<16x32xf32> to vector<16xf32>
    %188 = vector.shape_cast %187 : vector<16xf32> to vector<16x1xf32>
    %cst_81 = arith.constant 3.200000e+01 : f32
    %189 = vector.broadcast %cst_81 : f32 to vector<16x1xf32>
    %190 = arith.divf %188, %189 : vector<16x1xf32>
    %191 = vector.broadcast %183 : vector<16x1xf32> to vector<16x32xf32>
    %192 = arith.subf %175, %191 : vector<16x32xf32>
    %cst_82 = arith.constant 9.99999996E-13 : f32
    %193 = vector.broadcast %cst_82 : f32 to vector<16x1xf32>
    %194 = arith.addf %190, %193 : vector<16x1xf32>
    %195 = math.rsqrt %194 : vector<16x1xf32>
    %196 = vector.broadcast %195 : vector<16x1xf32> to vector<16x32xf32>
    %197 = arith.mulf %192, %196 : vector<16x32xf32>
    %198 = vector.broadcast %177 : vector<1x32xf32> to vector<16x32xf32>
    %199 = arith.mulf %197, %198 : vector<16x32xf32>
    %200 = vector.broadcast %179 : vector<1x32xf32> to vector<16x32xf32>
    %201 = arith.addf %199, %200 : vector<16x32xf32>
    %c1 = arith.constant 1 : index
    %c0_83 = arith.constant 0 : index
    %c0_84 = arith.constant 0 : index
    %202 = vector.load %arg4[%c1, %c0_83, %c0_84] : memref<2x32x96xf32, #tpu.memory_space<vmem>>, vector<1x32x96xf32>
    %203 = vector.shape_cast %202 : vector<1x32x96xf32> to vector<32x96xf32>
    %cst_85 = arith.constant dense<0.000000e+00> : vector<16x96xf32>
    %204 = tpu.matmul %201, %203, %cst_85 {dimension_numbers = #tpu.dot_dimension_numbers<[1], [0], [0], [1], [0, 0, 1, 1], [], []>} : vector<16x32xf32>, vector<32x96xf32>, vector<16x96xf32> -> vector<16x96xf32>
    %c1_86 = arith.constant 1 : index
    %c0_87 = arith.constant 0 : index
    %c0_88 = arith.constant 0 : index
    %205 = vector.load %arg5[%c1_86, %c0_87, %c0_88] : memref<2x1x96xf32, #tpu.memory_space<vmem>>, vector<1x1x96xf32>
    %206 = vector.shape_cast %205 : vector<1x1x96xf32> to vector<1x96xf32>
    %207 = vector.broadcast %206 : vector<1x96xf32> to vector<16x96xf32>
    %208 = arith.addf %204, %207 : vector<16x96xf32>
    %209 = vector.extract_strided_slice %208 {offsets = [0, 0], sizes = [16, 8], strides = [1, 1]} : vector<16x96xf32> to vector<16x8xf32>
    %210 = vector.shape_cast %209 : vector<16x8xf32> to vector<2x8x8xf32>
    %211 = vector.extract_strided_slice %208 {offsets = [0, 8], sizes = [16, 8], strides = [1, 1]} : vector<16x96xf32> to vector<16x8xf32>
    %212 = vector.shape_cast %211 : vector<16x8xf32> to vector<2x8x8xf32>
    %213 = vector.extract_strided_slice %208 {offsets = [0, 16], sizes = [16, 8], strides = [1, 1]} : vector<16x96xf32> to vector<16x8xf32>
    %214 = vector.shape_cast %213 : vector<16x8xf32> to vector<2x8x8xf32>
    %215 = vector.extract_strided_slice %208 {offsets = [0, 24], sizes = [16, 8], strides = [1, 1]} : vector<16x96xf32> to vector<16x8xf32>
    %216 = vector.shape_cast %215 : vector<16x8xf32> to vector<2x8x8xf32>
    %217 = tpu.concatenate %210, %212, %214, %216 in 0 : vector<2x8x8xf32>, vector<2x8x8xf32>, vector<2x8x8xf32>, vector<2x8x8xf32> -> vector<8x8x8xf32>
    %218 = vector.extract_strided_slice %208 {offsets = [0, 32], sizes = [16, 8], strides = [1, 1]} : vector<16x96xf32> to vector<16x8xf32>
    %219 = vector.shape_cast %218 : vector<16x8xf32> to vector<2x8x8xf32>
    %220 = vector.extract_strided_slice %208 {offsets = [0, 40], sizes = [16, 8], strides = [1, 1]} : vector<16x96xf32> to vector<16x8xf32>
    %221 = vector.shape_cast %220 : vector<16x8xf32> to vector<2x8x8xf32>
    %222 = vector.extract_strided_slice %208 {offsets = [0, 48], sizes = [16, 8], strides = [1, 1]} : vector<16x96xf32> to vector<16x8xf32>
    %223 = vector.shape_cast %222 : vector<16x8xf32> to vector<2x8x8xf32>
    %224 = vector.extract_strided_slice %208 {offsets = [0, 56], sizes = [16, 8], strides = [1, 1]} : vector<16x96xf32> to vector<16x8xf32>
    %225 = vector.shape_cast %224 : vector<16x8xf32> to vector<2x8x8xf32>
    %226 = tpu.concatenate %219, %221, %223, %225 in 0 : vector<2x8x8xf32>, vector<2x8x8xf32>, vector<2x8x8xf32>, vector<2x8x8xf32> -> vector<8x8x8xf32>
    %227 = vector.extract_strided_slice %208 {offsets = [0, 64], sizes = [16, 8], strides = [1, 1]} : vector<16x96xf32> to vector<16x8xf32>
    %228 = vector.shape_cast %227 : vector<16x8xf32> to vector<2x8x8xf32>
    %229 = vector.extract_strided_slice %208 {offsets = [0, 72], sizes = [16, 8], strides = [1, 1]} : vector<16x96xf32> to vector<16x8xf32>
    %230 = vector.shape_cast %229 : vector<16x8xf32> to vector<2x8x8xf32>
    %231 = vector.extract_strided_slice %208 {offsets = [0, 80], sizes = [16, 8], strides = [1, 1]} : vector<16x96xf32> to vector<16x8xf32>
    %232 = vector.shape_cast %231 : vector<16x8xf32> to vector<2x8x8xf32>
    %233 = vector.extract_strided_slice %208 {offsets = [0, 88], sizes = [16, 8], strides = [1, 1]} : vector<16x96xf32> to vector<16x8xf32>
    %234 = vector.shape_cast %233 : vector<16x8xf32> to vector<2x8x8xf32>
    %235 = tpu.concatenate %228, %230, %232, %234 in 0 : vector<2x8x8xf32>, vector<2x8x8xf32>, vector<2x8x8xf32>, vector<2x8x8xf32> -> vector<8x8x8xf32>
    "tpu.trace_start"() <{level = 10 : i32, message = "bqd,bkd->bqk"}> : () -> ()
    %cst_89 = arith.constant dense<0.000000e+00> : vector<8x8x8xf32>
    %236 = tpu.matmul %217, %226, %cst_89 {dimension_numbers = #tpu.dot_dimension_numbers<[2], [2], [1], [1], [0, 0, 0, 1, 1, 1], [0], [0]>} : vector<8x8x8xf32>, vector<8x8x8xf32>, vector<8x8x8xf32> -> vector<8x8x8xf32>
    "tpu.trace_stop"() : () -> ()
    %237 = arith.addf %236, %0 : vector<8x8x8xf32>
    %cst_90 = arith.constant dense<0xFF800000> : vector<8x8xf32>
    %238 = vector.multi_reduction <maximumf>, %237, %cst_90 [2] : vector<8x8x8xf32> to vector<8x8xf32>
    %239 = vector.shape_cast %238 : vector<8x8xf32> to vector<8x8x1xf32>
    %240 = vector.broadcast %239 : vector<8x8x1xf32> to vector<8x8x8xf32>
    %241 = arith.subf %237, %240 : vector<8x8x8xf32>
    %242 = math.exp %241 : vector<8x8x8xf32>
    %cst_91 = arith.constant dense<0.000000e+00> : vector<8x8xf32>
    %243 = vector.multi_reduction <add>, %242, %cst_91 [2] : vector<8x8x8xf32> to vector<8x8xf32>
    %244 = vector.shape_cast %243 : vector<8x8xf32> to vector<8x8x1xf32>
    %245 = tpu.reciprocal %244 {approx = true} : vector<8x8x1xf32> -> vector<8x8x1xf32>
    %246 = vector.broadcast %245 : vector<8x8x1xf32> to vector<8x8x8xf32>
    %247 = arith.mulf %242, %246 : vector<8x8x8xf32>
    "tpu.trace_start"() <{level = 10 : i32, message = "bqk,bkd->bqd"}> : () -> ()
    %cst_92 = arith.constant dense<0.000000e+00> : vector<8x8x8xf32>
    %248 = tpu.matmul %247, %235, %cst_92 {dimension_numbers = #tpu.dot_dimension_numbers<[2], [1], [1], [2], [0, 0, 0, 1, 1, 2], [0], [0]>} : vector<8x8x8xf32>, vector<8x8x8xf32>, vector<8x8x8xf32> -> vector<8x8x8xf32>
    "tpu.trace_stop"() : () -> ()
    %249 = vector.shape_cast %248 : vector<8x8x8xf32> to vector<64x8xf32>
    %250 = vector.shape_cast %249 : vector<64x8xf32> to vector<4x16x8xf32>
    %c1_93 = arith.constant 1 : index
    %c0_94 = arith.constant 0 : index
    %c0_95 = arith.constant 0 : index
    %c0_96 = arith.constant 0 : index
    %251 = vector.load %arg6[%c1_93, %c0_94, %c0_95, %c0_96] : memref<2x4x8x32xf32, #tpu.memory_space<vmem>>, vector<1x4x8x32xf32>
    %252 = vector.shape_cast %251 : vector<1x4x8x32xf32> to vector<4x8x32xf32>
    "tpu.trace_start"() <{level = 10 : i32, message = "hmd,hdo->hmo"}> : () -> ()
    %cst_97 = arith.constant dense<0.000000e+00> : vector<4x16x32xf32>
    %253 = tpu.matmul %250, %252, %cst_97 {dimension_numbers = #tpu.dot_dimension_numbers<[2], [1], [1], [2], [0, 0, 0, 1, 1, 2], [0], [0]>} : vector<4x16x8xf32>, vector<4x8x32xf32>, vector<4x16x32xf32> -> vector<4x16x32xf32>
    "tpu.trace_stop"() : () -> ()
    %254 = vector.extract_strided_slice %253 {offsets = [0, 0, 0], sizes = [1, 16, 32], strides = [1, 1, 1]} : vector<4x16x32xf32> to vector<1x16x32xf32>
    %255 = vector.shape_cast %254 : vector<1x16x32xf32> to vector<16x32xf32>
    %256 = vector.extract_strided_slice %253 {offsets = [1, 0, 0], sizes = [1, 16, 32], strides = [1, 1, 1]} : vector<4x16x32xf32> to vector<1x16x32xf32>
    %257 = vector.shape_cast %256 : vector<1x16x32xf32> to vector<16x32xf32>
    %258 = arith.addf %255, %257 : vector<16x32xf32>
    %259 = vector.extract_strided_slice %253 {offsets = [2, 0, 0], sizes = [1, 16, 32], strides = [1, 1, 1]} : vector<4x16x32xf32> to vector<1x16x32xf32>
    %260 = vector.shape_cast %259 : vector<1x16x32xf32> to vector<16x32xf32>
    %261 = arith.addf %258, %260 : vector<16x32xf32>
    %262 = vector.extract_strided_slice %253 {offsets = [3, 0, 0], sizes = [1, 16, 32], strides = [1, 1, 1]} : vector<4x16x32xf32> to vector<1x16x32xf32>
    %263 = vector.shape_cast %262 : vector<1x16x32xf32> to vector<16x32xf32>
    %264 = arith.addf %261, %263 : vector<16x32xf32>
    %c1_98 = arith.constant 1 : index
    %c0_99 = arith.constant 0 : index
    %c0_100 = arith.constant 0 : index
    %265 = vector.load %arg7[%c1_98, %c0_99, %c0_100] : memref<2x1x32xf32, #tpu.memory_space<vmem>>, vector<1x1x32xf32>
    %266 = vector.shape_cast %265 : vector<1x1x32xf32> to vector<1x32xf32>
    %267 = vector.broadcast %266 : vector<1x32xf32> to vector<16x32xf32>
    %268 = arith.addf %264, %267 : vector<16x32xf32>
    %269 = arith.addf %268, %201 : vector<16x32xf32>
    %c1_101 = arith.constant 1 : index
    %c0_102 = arith.constant 0 : index
    %c0_103 = arith.constant 0 : index
    %270 = vector.load %arg8[%c1_101, %c0_102, %c0_103] : memref<2x1x32xf32, #tpu.memory_space<vmem>>, vector<1x1x32xf32>
    %271 = vector.shape_cast %270 : vector<1x1x32xf32> to vector<1x32xf32>
    %c1_104 = arith.constant 1 : index
    %c0_105 = arith.constant 0 : index
    %c0_106 = arith.constant 0 : index
    %272 = vector.load %arg9[%c1_104, %c0_105, %c0_106] : memref<2x1x32xf32, #tpu.memory_space<vmem>>, vector<1x1x32xf32>
    %273 = vector.shape_cast %272 : vector<1x1x32xf32> to vector<1x32xf32>
    %cst_107 = arith.constant dense<0.000000e+00> : vector<16xf32>
    %274 = vector.multi_reduction <add>, %269, %cst_107 [1] : vector<16x32xf32> to vector<16xf32>
    %275 = vector.shape_cast %274 : vector<16xf32> to vector<16x1xf32>
    %cst_108 = arith.constant 3.200000e+01 : f32
    %276 = vector.broadcast %cst_108 : f32 to vector<16x1xf32>
    %277 = arith.divf %275, %276 : vector<16x1xf32>
    %278 = vector.broadcast %277 : vector<16x1xf32> to vector<16x32xf32>
    %279 = arith.subf %269, %278 : vector<16x32xf32>
    %280 = arith.mulf %279, %279 : vector<16x32xf32>
    %cst_109 = arith.constant dense<0.000000e+00> : vector<16xf32>
    %281 = vector.multi_reduction <add>, %280, %cst_109 [1] : vector<16x32xf32> to vector<16xf32>
    %282 = vector.shape_cast %281 : vector<16xf32> to vector<16x1xf32>
    %cst_110 = arith.constant 3.200000e+01 : f32
    %283 = vector.broadcast %cst_110 : f32 to vector<16x1xf32>
    %284 = arith.divf %282, %283 : vector<16x1xf32>
    %285 = vector.broadcast %277 : vector<16x1xf32> to vector<16x32xf32>
    %286 = arith.subf %269, %285 : vector<16x32xf32>
    %cst_111 = arith.constant 9.99999996E-13 : f32
    %287 = vector.broadcast %cst_111 : f32 to vector<16x1xf32>
    %288 = arith.addf %284, %287 : vector<16x1xf32>
    %289 = math.rsqrt %288 : vector<16x1xf32>
    %290 = vector.broadcast %289 : vector<16x1xf32> to vector<16x32xf32>
    %291 = arith.mulf %286, %290 : vector<16x32xf32>
    %292 = vector.broadcast %271 : vector<1x32xf32> to vector<16x32xf32>
    %293 = arith.mulf %291, %292 : vector<16x32xf32>
    %294 = vector.broadcast %273 : vector<1x32xf32> to vector<16x32xf32>
    %295 = arith.addf %293, %294 : vector<16x32xf32>
    %c1_112 = arith.constant 1 : index
    %c0_113 = arith.constant 0 : index
    %c0_114 = arith.constant 0 : index
    %296 = vector.load %arg10[%c1_112, %c0_113, %c0_114] : memref<2x32x64xf32, #tpu.memory_space<vmem>>, vector<1x32x64xf32>
    %297 = vector.shape_cast %296 : vector<1x32x64xf32> to vector<32x64xf32>
    %cst_115 = arith.constant dense<0.000000e+00> : vector<16x64xf32>
    %298 = tpu.matmul %295, %297, %cst_115 {dimension_numbers = #tpu.dot_dimension_numbers<[1], [0], [0], [1], [0, 0, 1, 1], [], []>} : vector<16x32xf32>, vector<32x64xf32>, vector<16x64xf32> -> vector<16x64xf32>
    %c1_116 = arith.constant 1 : index
    %c0_117 = arith.constant 0 : index
    %c0_118 = arith.constant 0 : index
    %299 = vector.load %arg11[%c1_116, %c0_117, %c0_118] : memref<2x1x64xf32, #tpu.memory_space<vmem>>, vector<1x1x64xf32>
    %300 = vector.shape_cast %299 : vector<1x1x64xf32> to vector<1x64xf32>
    %301 = vector.broadcast %300 : vector<1x64xf32> to vector<16x64xf32>
    %302 = arith.addf %298, %301 : vector<16x64xf32>
    %cst_119 = arith.constant 5.000000e-01 : f32
    %303 = vector.broadcast %cst_119 : f32 to vector<16x64xf32>
    %304 = arith.mulf %303, %302 : vector<16x64xf32>
    %cst_120 = arith.constant 0.707106769 : f32
    %305 = vector.broadcast %cst_120 : f32 to vector<16x64xf32>
    %306 = arith.mulf %302, %305 : vector<16x64xf32>
    %cst_121 = arith.constant 0.000000e+00 : f32
    %307 = vector.broadcast %cst_121 : f32 to vector<16x64xf32>
    %308 = arith.cmpf oge, %306, %307 : vector<16x64xf32>
    %cst_122 = arith.constant 1.000000e+00 : f32
    %cst_123 = arith.constant -1.000000e+00 : f32
    %309 = vector.broadcast %cst_122 : f32 to vector<16x64xf32>
    %310 = vector.broadcast %cst_123 : f32 to vector<16x64xf32>
    %311 = arith.select %308, %309, %310 : vector<16x64xi1>, vector<16x64xf32>
    %312 = math.absf %306 : vector<16x64xf32>
    %cst_124 = arith.constant 0.327591091 : f32
    %313 = vector.broadcast %cst_124 : f32 to vector<16x64xf32>
    %314 = arith.mulf %313, %312 : vector<16x64xf32>
    %cst_125 = arith.constant 1.000000e+00 : f32
    %315 = vector.broadcast %cst_125 : f32 to vector<16x64xf32>
    %316 = arith.addf %315, %314 : vector<16x64xf32>
    %cst_126 = arith.constant 1.000000e+00 : f32
    %317 = vector.broadcast %cst_126 : f32 to vector<16x64xf32>
    %318 = arith.divf %317, %316 : vector<16x64xf32>
    %cst_127 = arith.constant 1.06140542 : f32
    %319 = vector.broadcast %cst_127 : f32 to vector<16x64xf32>
    %320 = arith.mulf %319, %318 : vector<16x64xf32>
    %cst_128 = arith.constant -1.45315206 : f32
    %321 = vector.broadcast %cst_128 : f32 to vector<16x64xf32>
    %322 = arith.addf %320, %321 : vector<16x64xf32>
    %323 = arith.mulf %322, %318 : vector<16x64xf32>
    %cst_129 = arith.constant 1.42141378 : f32
    %324 = vector.broadcast %cst_129 : f32 to vector<16x64xf32>
    %325 = arith.addf %323, %324 : vector<16x64xf32>
    %326 = arith.mulf %325, %318 : vector<16x64xf32>
    %cst_130 = arith.constant -0.284496725 : f32
    %327 = vector.broadcast %cst_130 : f32 to vector<16x64xf32>
    %328 = arith.addf %326, %327 : vector<16x64xf32>
    %329 = arith.mulf %328, %318 : vector<16x64xf32>
    %cst_131 = arith.constant 0.254829586 : f32
    %330 = vector.broadcast %cst_131 : f32 to vector<16x64xf32>
    %331 = arith.addf %329, %330 : vector<16x64xf32>
    %332 = arith.mulf %331, %318 : vector<16x64xf32>
    %cst_132 = arith.constant 0.000000e+00 : f32
    %333 = vector.broadcast %cst_132 : f32 to vector<16x64xf32>
    %334 = arith.subf %333, %312 : vector<16x64xf32>
    %335 = arith.mulf %334, %312 : vector<16x64xf32>
    %336 = math.exp %335 : vector<16x64xf32>
    %337 = arith.mulf %332, %336 : vector<16x64xf32>
    %cst_133 = arith.constant 1.000000e+00 : f32
    %338 = vector.broadcast %cst_133 : f32 to vector<16x64xf32>
    %339 = arith.subf %338, %337 : vector<16x64xf32>
    %340 = arith.mulf %311, %339 : vector<16x64xf32>
    %cst_134 = arith.constant 1.000000e+00 : f32
    %341 = vector.broadcast %cst_134 : f32 to vector<16x64xf32>
    %342 = arith.addf %341, %340 : vector<16x64xf32>
    %343 = arith.mulf %304, %342 : vector<16x64xf32>
    %c1_135 = arith.constant 1 : index
    %c0_136 = arith.constant 0 : index
    %c0_137 = arith.constant 0 : index
    %344 = vector.load %arg12[%c1_135, %c0_136, %c0_137] : memref<2x64x32xf32, #tpu.memory_space<vmem>>, vector<1x64x32xf32>
    %345 = vector.shape_cast %344 : vector<1x64x32xf32> to vector<64x32xf32>
    %cst_138 = arith.constant dense<0.000000e+00> : vector<16x32xf32>
    %346 = tpu.matmul %343, %345, %cst_138 {dimension_numbers = #tpu.dot_dimension_numbers<[1], [0], [0], [1], [0, 0, 1, 1], [], []>} : vector<16x64xf32>, vector<64x32xf32>, vector<16x32xf32> -> vector<16x32xf32>
    %c1_139 = arith.constant 1 : index
    %c0_140 = arith.constant 0 : index
    %c0_141 = arith.constant 0 : index
    %347 = vector.load %arg13[%c1_139, %c0_140, %c0_141] : memref<2x1x32xf32, #tpu.memory_space<vmem>>, vector<1x1x32xf32>
    %348 = vector.shape_cast %347 : vector<1x1x32xf32> to vector<1x32xf32>
    %349 = vector.broadcast %348 : vector<1x32xf32> to vector<16x32xf32>
    %350 = arith.addf %346, %349 : vector<16x32xf32>
    %351 = arith.addf %350, %295 : vector<16x32xf32>
    %c1_142 = arith.constant 1 : index
    %c0_143 = arith.constant 0 : index
    %c0_144 = arith.constant 0 : index
    %352 = vector.load %arg14[%c1_142, %c0_143, %c0_144] : memref<2x1x32xf32, #tpu.memory_space<vmem>>, vector<1x1x32xf32>
    %353 = vector.shape_cast %352 : vector<1x1x32xf32> to vector<1x32xf32>
    %c1_145 = arith.constant 1 : index
    %c0_146 = arith.constant 0 : index
    %c0_147 = arith.constant 0 : index
    %354 = vector.load %arg15[%c1_145, %c0_146, %c0_147] : memref<2x1x32xf32, #tpu.memory_space<vmem>>, vector<1x1x32xf32>
    %355 = vector.shape_cast %354 : vector<1x1x32xf32> to vector<1x32xf32>
    %cst_148 = arith.constant dense<0.000000e+00> : vector<16xf32>
    %356 = vector.multi_reduction <add>, %351, %cst_148 [1] : vector<16x32xf32> to vector<16xf32>
    %357 = vector.shape_cast %356 : vector<16xf32> to vector<16x1xf32>
    %cst_149 = arith.constant 3.200000e+01 : f32
    %358 = vector.broadcast %cst_149 : f32 to vector<16x1xf32>
    %359 = arith.divf %357, %358 : vector<16x1xf32>
    %360 = vector.broadcast %359 : vector<16x1xf32> to vector<16x32xf32>
    %361 = arith.subf %351, %360 : vector<16x32xf32>
    %362 = arith.mulf %361, %361 : vector<16x32xf32>
    %cst_150 = arith.constant dense<0.000000e+00> : vector<16xf32>
    %363 = vector.multi_reduction <add>, %362, %cst_150 [1] : vector<16x32xf32> to vector<16xf32>
    %364 = vector.shape_cast %363 : vector<16xf32> to vector<16x1xf32>
    %cst_151 = arith.constant 3.200000e+01 : f32
    %365 = vector.broadcast %cst_151 : f32 to vector<16x1xf32>
    %366 = arith.divf %364, %365 : vector<16x1xf32>
    %367 = vector.broadcast %359 : vector<16x1xf32> to vector<16x32xf32>
    %368 = arith.subf %351, %367 : vector<16x32xf32>
    %cst_152 = arith.constant 9.99999996E-13 : f32
    %369 = vector.broadcast %cst_152 : f32 to vector<16x1xf32>
    %370 = arith.addf %366, %369 : vector<16x1xf32>
    %371 = math.rsqrt %370 : vector<16x1xf32>
    %372 = vector.broadcast %371 : vector<16x1xf32> to vector<16x32xf32>
    %373 = arith.mulf %368, %372 : vector<16x32xf32>
    %374 = vector.broadcast %353 : vector<1x32xf32> to vector<16x32xf32>
    %375 = arith.mulf %373, %374 : vector<16x32xf32>
    %376 = vector.broadcast %355 : vector<1x32xf32> to vector<16x32xf32>
    %377 = arith.addf %375, %376 : vector<16x32xf32>
    %c0_153 = arith.constant 0 : index
    %c0_154 = arith.constant 0 : index
    %378 = vector.load %arg18[%c0_153, %c0_154] : memref<16x32xf32, #tpu.memory_space<vmem>>, vector<16x32xf32>
    tpu.vector_store %arg18[%c0_153, %c0_154], %377 {strides = array<i32>} : memref<16x32xf32, #tpu.memory_space<vmem>>, vector<16x32xf32>,
    %c0_155 = arith.constant 0 : index
    %c0_156 = arith.constant 0 : index
    %379 = vector.load %arg16[%c0_155, %c0_156] : memref<32x32xf32, #tpu.memory_space<vmem>>, vector<32x32xf32>
    %cst_157 = arith.constant dense<0.000000e+00> : vector<16x32xf32>
    %380 = tpu.matmul %377, %379, %cst_157 {dimension_numbers = #tpu.dot_dimension_numbers<[1], [0], [0], [1], [0, 0, 1, 1], [], []>} : vector<16x32xf32>, vector<32x32xf32>, vector<16x32xf32> -> vector<16x32xf32>
    %c0_158 = arith.constant 0 : index
    %c0_159 = arith.constant 0 : index
    %381 = vector.load %arg17[%c0_158, %c0_159] : memref<1x32xf32, #tpu.memory_space<vmem>>, vector<1x32xf32>
    %382 = vector.broadcast %381 : vector<1x32xf32> to vector<16x32xf32>
    %383 = arith.addf %380, %382 : vector<16x32xf32>
    %384 = math.tanh %383 : vector<16x32xf32>
    %385 = vector.extract_strided_slice %384 {offsets = [0, 0], sizes = [1, 32], strides = [1, 1]} : vector<16x32xf32> to vector<1x32xf32>
    %c0_160 = arith.constant 0 : index
    %c0_161 = arith.constant 0 : index
    %386 = vector.load %arg19[%c0_160, %c0_161] : memref<2x32xf32, #tpu.memory_space<vmem>>, vector<1x32xf32>
    tpu.vector_store %arg19[%c0_160, %c0_161], %385 {strides = array<i32>} : memref<2x32xf32, #tpu.memory_space<vmem>>, vector<1x32xf32>,
    %387 = vector.extract_strided_slice %384 {offsets = [8, 0], sizes = [1, 32], strides = [1, 1]} : vector<16x32xf32> to vector<1x32xf32>
    %c1_162 = arith.constant 1 : index
    %c0_163 = arith.constant 0 : index
    %388 = vector.load %arg19[%c1_162, %c0_163] : memref<2x32xf32, #tpu.memory_space<vmem>>, vector<1x32xf32>
    tpu.vector_store %arg19[%c1_162, %c0_163], %387 {strides = array<i32>} : memref<2x32xf32, #tpu.memory_space<vmem>>, vector<1x32xf32>,
    return
  }
}

</mosaic_0001>

<bundles_post_ra>
// kernel: tpu_custom_call.1
= control target key start
LH: loop header
LB: loop body
LE: loop exit
PB: predicated region body
PF: predicated region fallthrough
CT: control target
= control target key end

     0   :  { %s6408_s0 = inlined_call_operand.hbm [shape: f32[16,32], index: 0, kind: input, shape index: {}]   ;;  %s6409_s1 = inlined_call_operand.vmem [shape: f32[8,8,8], index: 1, kind: input, shape index: {}]   ;;  %s6410_s2 = inlined_call_operand.hbm [shape: f32[1,32], index: 2, kind: input, shape index: {}]   ;;  %s6411_s3 = inlined_call_operand.hbm [shape: f32[1,32], index: 3, kind: input, shape index: {}]   ;;  %s6412_s4 = inlined_call_operand.vmem [shape: f32[2,32,96], index: 4, kind: input, shape index: {}]   ;;  %s6413_s5 = inlined_call_operand.vmem [shape: f32[2,1,96], index: 5, kind: input, shape index: {}]   ;;  %s6414_s6 = inlined_call_operand.vmem [shape: f32[2,4,8,32], index: 6, kind: input, shape index: {}]   ;;  %s6415_s7 = inlined_call_operand.hbm [shape: f32[2,1,32], index: 7, kind: input, shape index: {}]   ;;  %s6416_s8 = inlined_call_operand.hbm [shape: f32[2,1,32], index: 8, kind: input, shape index: {}]   ;;  %s6417_s9 = inlined_call_operand.hbm [shape: f32[2,1,32], index: 9, kind: input, shape index: {}]   ;;  %s6418_s10 = inlined_call_operand.hbm [shape: f32[2,32,64], index: 10, kind: input, shape index: {}]   ;;  %s6419_s11 = inlined_call_operand.vmem [shape: f32[2,1,64], index: 11, kind: input, shape index: {}]   ;;  %s6420_s12 = inlined_call_operand.vmem [shape: f32[2,64,32], index: 12, kind: input, shape index: {}]   ;;  %s6421_s13 = inlined_call_operand.vmem [shape: f32[2,1,32], index: 13, kind: input, shape index: {}]   ;;  %s6422_s14 = inlined_call_operand.vmem [shape: f32[2,1,32], index: 14, kind: input, shape index: {}]   ;;  %s6423_s15 = inlined_call_operand.vmem [shape: f32[2,1,32], index: 15, kind: input, shape index: {}]   ;;  %s6424_s16 = inlined_call_operand.vmem [shape: f32[32,32], index: 16, kind: input, shape index: {}]   ;;  %s6425_s17 = inlined_call_operand.vmem [shape: f32[1,32], index: 17, kind: input, shape index: {}]   ;;  %s6426_s18 = inlined_call_operand.hbm [shape: f32[16,32], index: 18, kind: output, shape index: {0}]   ;;  %s6427_s19 = inlined_call_operand.hbm [shape: f32[2,32], index: 19, kind: output, shape index: {1}]  }
   0x1   :  { %6435 = sst [smem:[#allocation23_spill]] %s6408_s0 }
   0x2   :  { %6436 = sst [smem:[#allocation24_spill]] %s6409_s1 }
   0x3   :  { %6437 = sst [smem:[#allocation25_spill]] %s6410_s2 }
   0x4   :  { %6438 = sst [smem:[#allocation26_spill]] %s6411_s3 }
   0x5   :  { %6439 = sst [smem:[#allocation27_spill]] %s6427_s19 }
   0x6   :  { %25 = vsyncpa [#allocation3], 0 }
   0x7   :  { %26 = vsyncpa [#allocation6], 0 }
   0x8   :  { %27 = vsyncpa [#allocation9], 0 }
   0x9   :  { %28 = vsyncpa [#allocation12], 0 }
   0xa   :  { %29 = vsyncpa [#allocation4], 0 }
   0xb   :  { %30 = vsyncpa [#allocation16], 0  ;;  %s5499_s0 = smov [#allocation5]   ;;  %s5500_s20 = smov [#allocation8]  }
   0xc   :  { %s51_s30 = sshll.u32 %s5499_s0, 4  ;;  %s76_s21 = sshll.u32 %s5500_s20, 4  ;;  %s52_s30 = int_to_ptr.vmem [resolvable:$true] %s51_s30  ;;  %s5620_s21 = int_to_ptr.vmem [resolvable:$true] %s76_s21 }
   0xd   :  { %s6440_s2 = sld [smem:[#allocation25_spill]] }
  0x13   :  { %s5289_s23 = scalar_lea.hbm %s6440_s2, 16 }
  0x14   :  { %p5290_p0 = scmp.ne.s32.totalorder %s6440_s2, %s5289_s23  ;;  %p5293_p1 = scmp.lt.u32.totalorder %s5289_s23, %s6440_s2 }
  0x16   :  { %p5295_p2 = pnand %p5293_p1, %p5290_p0 }
  0x18   :  { %5298 = shalt.err (!%p5295_p2)
}
  0x19   :  { %s5299_s27 = scalar_lea.vmem %s52_s30, 16  ;;  %s5303_s28 = scalar_lea.vmem %s52_s30, 32 }
  0x1a   :  { %p5300_p3 = scmp.ne.s32.totalorder %s52_s30, %s5299_s27  ;;  %p5304_p4 = scmp.lt.s32.totalorder %s52_s30, %s52_s30 }
  0x1b   :  { %p5305_p5 = scmp.lt.s32.totalorder %s5303_s28, %s5299_s27 }
  0x1d   :  { %p5306_p6 = por %p5305_p5, %p5304_p4 }
  0x1f   :  { %p5307_p7 = pnand %p5306_p6, %p5300_p3 }
  0x21   :  { %5310 = shalt.err (!%p5307_p7)
}
  0x22   :  { %54 = dma.hbm_to_vmem [thread:$0]  %s6440_s2, 16, %s52_s30, [#allocation6]  }
  0x23   :  { %s5311_s22 = scalar_lea.hbm %s6415_s7, 32 }
  0x24   :  { %p5312_p8 = scmp.ne.s32.totalorder %s6415_s7, %s5311_s22  ;;  %p5315_p9 = scmp.lt.u32.totalorder %s5311_s22, %s6415_s7 }
  0x26   :  { %p5317_p10 = pnand %p5315_p9, %p5312_p8 }
  0x28   :  { %5320 = shalt.err (!%p5317_p10)
}
  0x29   :  { %s5321_s26 = scalar_lea.vmem %s5620_s21, 32  ;;  %p5326_p12 = scmp.lt.s32.totalorder %s5620_s21, %s5620_s21 }
  0x2a   :  { %p5322_p11 = scmp.ne.s32.totalorder %s5620_s21, %s5321_s26  ;;  %p5327_p13 = scmp.lt.s32.totalorder %s5321_s26, %s5321_s26 }
  0x2c   :  { %p5328_p0 = por %p5327_p13, %p5326_p12 }
  0x2e   :  { %p5329_p1 = pnand %p5328_p0, %p5322_p11 }
  0x30   :  { %5332 = shalt.err (!%p5329_p1)
}
  0x31   :  { %s6433_s30 = smov 16   ;;  %s6434_s2 = smov 1  }
  0x32   :  { %82 = dma.hbm_to_vmem [thread:$0]  %s6415_s7, 32, %s5620_s21, [#allocation9], %s6433_s30, %s6433_s30, %s6434_s2  }
  0x33   :  { %s5503_s29 = smov [#allocation11]   ;;  %s5504_s20 = smov [#allocation2]  }
  0x34   :  { %s100_s0 = sshll.u32 %s5503_s29, 4  ;;  %s36_s1 = sshll.u32 %s5504_s20, 4  ;;  %s101_s0 = int_to_ptr.vmem [resolvable:$true] %s100_s0  ;;  %s5654_s1 = int_to_ptr.vmem [resolvable:$true] %s36_s1 }
  0x35   :  { %s5333_s23 = scalar_lea.hbm %s6417_s9, 32 }
  0x36   :  { %p5334_p2 = scmp.ne.s32.totalorder %s6417_s9, %s5333_s23  ;;  %p5337_p3 = scmp.lt.u32.totalorder %s5333_s23, %s6417_s9 }
  0x38   :  { %p5339_p4 = pnand %p5337_p3, %p5334_p2 }
  0x3a   :  { %5342 = shalt.err (!%p5339_p4)
}
  0x3b   :  { %s5343_s7 = scalar_lea.vmem %s101_s0, 32  ;;  %p5348_p6 = scmp.lt.s32.totalorder %s101_s0, %s101_s0 }
  0x3c   :  { %p5344_p5 = scmp.ne.s32.totalorder %s101_s0, %s5343_s7  ;;  %p5349_p7 = scmp.lt.s32.totalorder %s5343_s7, %s5343_s7 }
  0x3e   :  { %p5350_p8 = por %p5349_p7, %p5348_p6 }
  0x40   :  { %p5351_p9 = pnand %p5350_p8, %p5344_p5 }
  0x42   :  { %5354 = shalt.err (!%p5351_p9)
}
  0x43   :  { %106 = dma.hbm_to_vmem [thread:$0]  %s6417_s9, 32, %s101_s0, [#allocation12], %s6433_s30, %s6433_s30, %s6434_s2  }
  0x44   :  { %s6441_s19 = sld [smem:[#allocation23_spill]] }
  0x4a   :  { %s5355_s20 = scalar_lea.hbm %s6441_s19, 256 }
  0x4b   :  { %p5356_p10 = scmp.ne.s32.totalorder %s6441_s19, %s5355_s20  ;;  %p5359_p11 = scmp.lt.u32.totalorder %s5355_s20, %s6441_s19 }
  0x4d   :  { %p5361_p12 = pnand %p5359_p11, %p5356_p10 }
  0x4f   :  { %5364 = shalt.err (!%p5361_p12)
}
  0x50   :  { %s5365_s3 = scalar_lea.vmem %s5654_s1, 256  ;;  %p5370_p0 = scmp.lt.s32.totalorder %s5654_s1, %s5654_s1 }
  0x51   :  { %p5366_p13 = scmp.ne.s32.totalorder %s5654_s1, %s5365_s3  ;;  %p5371_p1 = scmp.lt.s32.totalorder %s5365_s3, %s5365_s3 }
  0x53   :  { %p5372_p2 = por %p5371_p1, %p5370_p0 }
  0x55   :  { %p5373_p3 = pnand %p5372_p2, %p5366_p13 }
  0x57   :  { %5376 = shalt.err (!%p5373_p3)
}
  0x58   :  { %s5505_s9 = smov 128   ;;  %s5506_s0 = smov 8  }
  0x59   :  { %42 = dma.hbm_to_vmem [thread:$0]  %s6441_s19, 256, %s5654_s1, [#allocation3], %s5505_s9, %s5505_s9, %s5506_s0  }
  0x5a   :  { %s5507_s21 = smov [#allocation7]   ;;  %s5508_s28 = smov [#allocation10]  }
  0x5b   :  { %s61_s27 = sshll.u32 %s5507_s21, 4  ;;  %s88_s29 = sshll.u32 %s5508_s28, 4  ;;  %s62_s27 = int_to_ptr.vmem [resolvable:$true] %s61_s27  ;;  %s5691_s29 = int_to_ptr.vmem [resolvable:$true] %s88_s29 }
  0x5c   :  { %s6442_s24 = sld [smem:[#allocation26_spill]] }
  0x62   :  { %s5377_s23 = scalar_lea.hbm %s6442_s24, 16 }
  0x63   :  { %p5378_p4 = scmp.ne.s32.totalorder %s6442_s24, %s5377_s23  ;;  %p5381_p5 = scmp.lt.u32.totalorder %s5377_s23, %s6442_s24 }
  0x65   :  { %p5383_p6 = pnand %p5381_p5, %p5378_p4 }
  0x67   :  { %5386 = shalt.err (!%p5383_p6)
}
  0x68   :  { %s5387_s1 = scalar_lea.vmem %s62_s27, 16  ;;  %s5391_s19 = scalar_lea.vmem %s62_s27, 32 }
  0x69   :  { %p5388_p7 = scmp.ne.s32.totalorder %s62_s27, %s5387_s1  ;;  %p5392_p8 = scmp.lt.s32.totalorder %s62_s27, %s62_s27 }
  0x6a   :  { %p5393_p9 = scmp.lt.s32.totalorder %s5391_s19, %s5387_s1 }
  0x6c   :  { %p5394_p10 = por %p5393_p9, %p5392_p8 }
  0x6e   :  { %p5395_p11 = pnand %p5394_p10, %p5388_p7 }
  0x70   :  { %5398 = shalt.err (!%p5395_p11)
}
  0x71   :  { %64 = dma.hbm_to_vmem [thread:$0]  %s6442_s24, 16, %s62_s27, [#allocation6]  }
  0x72   :  { %s5399_s20 = scalar_lea.hbm %s6416_s8, 32 }
  0x73   :  { %p5400_p12 = scmp.ne.s32.totalorder %s6416_s8, %s5399_s20  ;;  %p5403_p13 = scmp.lt.u32.totalorder %s5399_s20, %s6416_s8 }
  0x75   :  { %p5405_p0 = pnand %p5403_p13, %p5400_p12 }
  0x77   :  { %5408 = shalt.err (!%p5405_p0)
}
  0x78   :  { %s5409_s25 = scalar_lea.vmem %s5691_s29, 32  ;;  %p5414_p2 = scmp.lt.s32.totalorder %s5691_s29, %s5691_s29 }
  0x79   :  { %p5410_p1 = scmp.ne.s32.totalorder %s5691_s29, %s5409_s25  ;;  %p5415_p3 = scmp.lt.s32.totalorder %s5409_s25, %s5409_s25 }
  0x7b   :  { %p5416_p4 = por %p5415_p3, %p5414_p2 }
  0x7d   :  { %p5417_p5 = pnand %p5416_p4, %p5410_p1 }
  0x7f   :  { %5420 = shalt.err (!%p5417_p5)
}
  0x80   :  { %s6443_s27 = smov 1   ;;  %s6444_s24 = smov 16  }
  0x81   :  { %94 = dma.hbm_to_vmem [thread:$0]  %s6416_s8, 32, %s5691_s29, [#allocation9], %s6444_s24, %s6444_s24, %s6443_s27  }
  0x82   :  { %s5509_s19 = smov [#allocation13]   ;;  %s5421_s28 = scalar_lea.hbm %s6418_s10, 1024 }
  0x83   :  { %s112_s26 = sshll.u32 %s5509_s19, 4  ;;  %p5422_p6 = scmp.ne.s32.totalorder %s6418_s10, %s5421_s28  ;;  %s113_s26 = int_to_ptr.vmem [resolvable:$true] %s112_s26 }
  0x84   :  { %p5425_p7 = scmp.lt.u32.totalorder %s5421_s28, %s6418_s10 }
  0x86   :  { %p5427_p8 = pnand %p5425_p7, %p5422_p6 }
  0x88   :  { %5430 = shalt.err (!%p5427_p8)
}
  0x89   :  { %s5431_s23 = scalar_lea.vmem %s113_s26, 1024  ;;  %p5436_p10 = scmp.lt.s32.totalorder %s113_s26, %s113_s26 }
  0x8a   :  { %p5432_p9 = scmp.ne.s32.totalorder %s113_s26, %s5431_s23  ;;  %p5437_p11 = scmp.lt.s32.totalorder %s5431_s23, %s5431_s23 }
  0x8c   :  { %p5438_p12 = por %p5437_p11, %p5436_p10 }
  0x8e   :  { %p5439_p13 = pnand %p5438_p12, %p5432_p9 }
  0x90   :  { %5442 = shalt.err (!%p5439_p13)
}
  0x91   :  { %118 = dma.hbm_to_vmem [thread:$0]  %s6418_s10, 1024, %s113_s26, [#allocation12], %s5505_s9, %s5505_s9, %s5506_s0  }
  0x92   :  { %5487 = dma.done.wait [#allocation3], 256  }
  0x93   :  { %5488 = vsyncadd [#allocation3], 4294967040 }
  0x94   :  { %5489 = dma.done.wait [#allocation6], 32  }
  0x95   :  { %5490 = vsyncadd [#allocation6], 4294967264 }
  0x96   :  { %5491 = dma.done.wait [#allocation9], 64  }
  0x97   :  { %5492 = vsyncadd [#allocation9], 4294967232 }
  0x98   :  { %5493 = dma.done.wait [#allocation12], 1056  }
  0x99   :  { %5494 = vsyncadd [#allocation12], 4294966240  ;;  %vm166_vm0 = vcmask 261120   ;;  %v162_v0 = vld [vmem:[#allocation2] sm:$0xff]  ;;  %v163_v1 = vld [vmem:[#allocation2 + $0x8] sm:$0xff]  ;;  %v5510_v37 = vmov 0.0  }
  0x9a   :  { %v167_v2 = vsel %vm166_vm0, %v162_v0, 0.0  ;;  %v170_v3 = vsel %vm166_vm0, %v163_v1, 0.0  ;;  %v210_v14 = vld [vmem:[%s6412_s4] sm:$0xff]  ;;  %v211_v15 = vld [vmem:[%s6412_s4 + $0x8] sm:$0xff]  ;;  %v212_v16 = vld [vmem:[%s6412_s4 + $0x10] sm:$0xff]  ;;  %4798 = vmatprep.subr.mxu1 %v5510_v37  ;;  %vm5511_vm1 = vmmov 0  }
  0x9b   :  { %168 = vadd.xlane.f32.xlu0 %v167_v2  ;;  %v5080_v17 = vpack.c.bf16 %v211_v15, %v210_v14  ;;  %v213_v18 = vld [vmem:[%s6412_s4 + $0x18] sm:$0xff]  ;;  %v4531_v27 = vld [vmem:[#allocation5] ss:$0 sm:$0xff]  ;;  %v4532_v29 = vld [vmem:[#allocation7] ss:$0 sm:$0xff]  ;;  %4800 = vmatprep.mubr.msk.f32.mxu1 %vm5511_vm1, %v5510_v37  ;;  %s5512_s28 = smov 120  }
  0x9c   :  { %v5084_v19 = vpack.c.bf16 %v213_v18, %v212_v16  ;;  %v4533_v36 = vld [vmem:[%s6413_s5] ss:$0 sm:$0xff]  ;;  %s5513_s20 = smov 112   ;;  %s5514_s30 = smov 104   ;;  %vm318_vm2 = vcmask 64512   ;;  %vm2171_vm5 = vcmask 523264  }
  0x9d   :  { %5081 = vmatprep.subr.bf16.mxu0 %v5080_v17  ;;  %s5515_s2 = smov 96   ;;  %s6445_s8 = sld [smem:[#allocation24_spill]] }
  0x9e   :  { %5083 = vmatpush3.bf16.msra.mxu0 %v5080_v17 }
  0x9f   :  { %171 = vadd.xlane.f32.xlu0 %v170_v3  ;;  %5085 = vmatprep.subr.bf16.mxu0 %v5084_v19 }
  0xa2   :  { %5087 = vmatpush3.bf16.msra.mxu0 %v5084_v19 }
  0xa3   :  { %4808 = vmatprep.subr.mxu0 %v5510_v37  ;;  %v5868_v56 = vld [vmem:[%s6445_s8] sm:$0xff]  ;;  %v5875_v61 = vld [vmem:[%s6445_s8 + $0x8] sm:$0xff]  ;;  %v5882_v2 = vld [vmem:[%s6445_s8 + $0x18] sm:$0xff] }
  0xa4   :  { %v5900_v14 = vld [vmem:[%s6445_s8 + $0x28] sm:$0xff]  ;;  %v5909_v18 = vld [vmem:[%s6445_s8 + $0x30] sm:$0xff] }
 0x128   :  { %v169_v4 = vpop.xlane.xlu0 %168 }
 0x129   :  { %v174_v5 = vmul.f32 0.03125, %v169_v4  ;;  %v5887_v4 = vld [vmem:[%s6445_s8 + $0x10] sm:$0xff] }
 0x12b   :  { %v176_v6 = vsub.f32 %v162_v0, %v174_v5 }
 0x12c   :  { %v172_v7 = vpop.xlane.xlu0 %171 }
 0x12d   :  { %v175_v8 = vmul.f32 0.03125, %v172_v7  ;;  %v178_v9 = vmul.f32 %v176_v6, %v176_v6 }
 0x12f   :  { %v177_v10 = vsub.f32 %v163_v1, %v175_v8  ;;  %v180_v11 = vsel %vm166_vm0, %v178_v9, 0.0 }
 0x130   :  { %181 = vadd.xlane.f32.xlu1 %v180_v11  ;;  %v5895_v11 = vld [vmem:[%s6445_s8 + $0x20] sm:$0xff] }
 0x131   :  { %v179_v12 = vmul.f32 %v177_v10, %v177_v10 }
 0x133   :  { %v183_v13 = vsel %vm166_vm0, %v179_v12, 0.0 }
 0x134   :  { %184 = vadd.xlane.f32.xlu1 %v183_v13 }
 0x1bd   :  { %v182_v20 = vpop.xlane.xlu1 %181 }
 0x1be   :  { %v186_v21 = vmul.f32 0.03125, %v182_v20 }
 0x1c0   :  { %v188_v22 = vadd.f32 1e-12, %v186_v21 }
 0x1c1   :  { %v185_v23 = vpop.xlane.xlu1 %184 }
 0x1c2   :  { %5185 = vrsqrt.f32 %v188_v22  ;;  %v187_v24 = vmul.f32 0.03125, %v185_v23  ;;  %v5917_v23 = vld [vmem:[%s6445_s8 + $0x38] sm:$0xff]  ;;  %s5516_s8 = smov 64  }
 0x1c4   :  { %v189_v25 = vadd.f32 1e-12, %v187_v24 }
 0x1c6   :  { %5187 = vrsqrt.f32 %v189_v25 }
 0x1cc   :  { %v5186_v26 = vpop.eup %5185 }
 0x1cd   :  { %v192_v28 = vmul.f32 %v5186_v26, %v176_v6 }
 0x1cf   :  { %v200_v30 = vmul.f32 %v4531_v27, %v192_v28 }
 0x1d0   :  { %v5188_v31 = vpop.eup %5187 }
 0x1d1   :  { %v193_v32 = vmul.f32 %v5188_v31, %v177_v10  ;;  %v5756_v33 = vadd.f32 %v4532_v29, %v200_v30 }
 0x1d3   :  { %v201_v34 = vmul.f32 %v4531_v27, %v193_v32  ;;  %4795 = vmatprep.mubr.msk.f32.mxu0 %vm166_vm0, %v5756_v33 }
 0x1d5   :  { %v5760_v35 = vadd.f32 %v4532_v29, %v201_v34 }
 0x1d7   :  { %4796 = vmatmul.mubr.msk.f32.vlgmr.msra.gmra.mrb[0].mxu0 %vm166_vm0, %v5760_v35 }
 0x1d8   :  { %4810 = vmatprep.mubr.msk.f32.mxu0 %vm5511_vm1, %v5510_v37 }
 0x2aa   :  { %v4797_v38 = vpop.f32.mrb[0].mxu0 }
 0x2ab   :  { %v5773_v39 = vadd.f32 %v4797_v38, %v4533_v36  ;;  %v293_v40 = vpop.f32.mrb[1].mxu0 }
 0x2ac   :  { %v5775_v41 = vadd.f32 %v4533_v36, %v293_v40 }
 0x2ad   :  { %306 = vrot.lane.b32.xlu1 %v5773_v39, %s5512_s28 }
 0x2ae   :  { %304 = vrot.lane.b32.xlu0 %v5775_v41, %s5512_s28 }
 0x2b1   :  { %308 = vrot.lane.b32.xlu1 %v5775_v41, %s5513_s20 }
 0x2b2   :  { %312 = vrot.lane.b32.xlu0 %v5775_v41, %s5514_s30 }
 0x2b5   :  { %310 = vrot.lane.b32.xlu1 %v5773_v39, %s5513_s20 }
 0x2b6   :  { %316 = vrot.lane.b32.xlu0 %v5775_v41, %s5515_s2 }
 0x2b9   :  { %314 = vrot.lane.b32.xlu1 %v5773_v39, %s5514_s30 }
 0x2bd   :  { %393 = vrot.lane.b32.xlu1 %v5773_v39, %s5515_s2 }
 0x31f   :  { %v5793_v42 = vpop.permute.xlu1 %306 }
 0x320   :  { %545 = vrot.lane.b32.xlu1 %v5793_v42, %s5515_s2  ;;  %v5797_v43 = vpop.permute.xlu0 %304 }
 0x321   :  { %469 = vrot.lane.b32.xlu0 %v5797_v43, %s5515_s2 }
 0x323   :  { %v5801_v44 = vpop.permute.xlu1 %308 }
 0x324   :  { %v5803_v45 = vpop.permute.xlu0 %312 }
 0x325   :  { %621 = vrot.lane.b32.xlu0 %v5801_v44, %s5515_s2 }
 0x327   :  { %v5807_v46 = vpop.permute.xlu1 %310 }
 0x328   :  { %697 = vrot.lane.b32.xlu1 %v5807_v46, %s5515_s2  ;;  %v317_v47 = vpop.permute.xlu0 %316 }
 0x329   :  { %773 = vrot.lane.b32.xlu0 %v5803_v45, %s5515_s2  ;;  %4799 = vmatpush3.xpose.msk.msra.mxu1 %vm318_vm2, %v317_v47 }
 0x32a   :  { %4803 = vmatprep.subr.mxu1 %v5510_v37 }
 0x32b   :  { %v5815_v48 = vpop.permute.xlu1 %314 }
 0x32c   :  { %849 = vrot.lane.b32.xlu1 %v5815_v48, %s5515_s2  ;;  %4801 = vmatmul.mubr.msk.f32.vlgmr.msra.gmra.mrb[0].mxu1 %vm318_vm2, %v5775_v41 }
 0x32d   :  { %4805 = vmatprep.mubr.msk.f32.mxu1 %vm5511_vm1, %v5510_v37 }
 0x32f   :  { %v394_v49 = vpop.permute.xlu1 %393 }
 0x330   :  { %4804 = vmatpush3.xpose.msk.msra.mxu1 %vm318_vm2, %v394_v49 }
 0x331   :  { %4813 = vmatprep.subr.mxu1 %v5510_v37 }
 0x333   :  { %4806 = vmatmul.mubr.msk.f32.vlgmr.msra.gmra.mrb[2].mxu1 %vm318_vm2, %v5773_v39 }
 0x334   :  { %4815 = vmatprep.mubr.msk.f32.mxu1 %vm5511_vm1, %v5510_v37 }
 0x392   :  { %v546_v50 = vpop.permute.xlu1 %545 }
 0x393   :  { %4814 = vmatpush3.xpose.msk.msra.mxu1 %vm318_vm2, %v546_v50  ;;  %v470_v51 = vpop.permute.xlu0 %469 }
 0x394   :  { %4809 = vmatpush3.xpose.msk.msra.mxu0 %vm318_vm2, %v470_v51  ;;  %4823 = vmatprep.subr.mxu1 %v5510_v37 }
 0x395   :  { %4818 = vmatprep.subr.mxu0 %v5510_v37 }
 0x396   :  { %4816 = vmatmul.mubr.msk.f32.vlgmr.msra.gmra.mrb[4].mxu1 %vm318_vm2, %v5793_v42 }
 0x397   :  { %4811 = vmatmul.mubr.msk.f32.vlgmr.msra.gmra.mrb[2].mxu0 %vm318_vm2, %v5797_v43  ;;  %v622_v52 = vpop.permute.xlu0 %621  ;;  %4825 = vmatprep.mubr.msk.f32.mxu1 %vm5511_vm1, %v5510_v37 }
 0x398   :  { %4819 = vmatpush3.xpose.msk.msra.mxu0 %vm318_vm2, %v622_v52  ;;  %4820 = vmatprep.mubr.msk.f32.mxu0 %vm5511_vm1, %v5510_v37 }
 0x399   :  { %4828 = vmatprep.subr.mxu0 %v5510_v37 }
 0x39a   :  { %v698_v53 = vpop.permute.xlu1 %697 }
 0x39b   :  { %4821 = vmatmul.mubr.msk.f32.vlgmr.msra.gmra.mrb[4].mxu0 %vm318_vm2, %v5801_v44  ;;  %4824 = vmatpush3.xpose.msk.msra.mxu1 %vm318_vm2, %v698_v53  ;;  %v774_v54 = vpop.permute.xlu0 %773 }
 0x39c   :  { %4829 = vmatpush3.xpose.msk.msra.mxu0 %vm318_vm2, %v774_v54  ;;  %4830 = vmatprep.mubr.msk.f32.mxu0 %vm5511_vm1, %v5510_v37 }
 0x39d   :  { %4833 = vmatprep.subr.mxu1 %v5510_v37  ;;  %4838 = vmatprep.subr.mxu0 %v5510_v37 }
 0x39e   :  { %v850_v55 = vpop.permute.xlu1 %849  ;;  %4826 = vmatmul.mubr.msk.f32.vlgmr.msra.gmra.mrb[6].mxu1 %vm318_vm2, %v5807_v46 }
 0x39f   :  { %4831 = vmatmul.mubr.msk.f32.vlgmr.msra.gmra.mrb[6].mxu0 %vm318_vm2, %v5803_v45  ;;  %4834 = vmatpush3.xpose.msk.msra.mxu1 %vm318_vm2, %v850_v55 }
 0x3a0   :  { %4835 = vmatprep.mubr.msk.f32.mxu1 %vm5511_vm1, %v5510_v37  ;;  %4843 = vmatprep.subr.mxu1 %v5510_v37 }
 0x3a1   :  { %4840 = vmatprep.mubr.msk.f32.mxu0 %vm5511_vm1, %v5510_v37 }
 0x3a2   :  { %4836 = vmatmul.mubr.msk.f32.vlgmr.msra.gmra.mrb[8].mxu1 %vm318_vm2, %v5815_v48 }
 0x3a3   :  { %4845 = vmatprep.mubr.msk.f32.mxu1 %vm5511_vm1, %v5510_v37 }
 0x3ff   :  { %v389_v57 = vpop.f32.mrb[0].mxu1 }
 0x400   :  { %v390_v58 = vadd.f32 %v389_v57, %v5868_v56  ;;  %v4802_v59 = vpop.f32.mrb[1].mxu1 }
 0x402   :  { %v925_v60 = vsel %vm318_vm2, %v390_v58, -inf }
 0x403   :  { %926 = vmax.xlane.f32.xlu0 %v925_v60 }
 0x406   :  { %v465_v62 = vpop.f32.mrb[2].mxu1 }
 0x407   :  { %v466_v63 = vadd.f32 %v465_v62, %v5875_v61  ;;  %v4807_v0 = vpop.f32.mrb[3].mxu1 }
 0x409   :  { %v928_v1 = vsel %vm318_vm2, %v466_v63, -inf }
 0x40a   :  { %929 = vmax.xlane.f32.xlu1 %v928_v1 }
 0x469   :  { %v617_v3 = vpop.f32.mrb[4].mxu1 }
 0x46a   :  { %v618_v5 = vadd.f32 %v617_v3, %v5882_v2  ;;  %v541_v6 = vpop.f32.mrb[2].mxu0  ;;  %v4817_v7 = vpop.f32.mrb[5].mxu1 }
 0x46b   :  { %v4812_v8 = vpop.f32.mrb[3].mxu0  ;;  %v542_v9 = vadd.f32 %v541_v6, %v5887_v4 }
 0x46c   :  { %v934_v10 = vsel %vm318_vm2, %v618_v5, -inf }
 0x46d   :  { %935 = vmax.xlane.f32.xlu0 %v934_v10  ;;  %v931_v16 = vsel %vm318_vm2, %v542_v9, -inf }
 0x46e   :  { %v693_v12 = vpop.f32.mrb[4].mxu0 }
 0x46f   :  { %v4822_v13 = vpop.f32.mrb[5].mxu0  ;;  %v5903_v15 = vadd.f32 %v693_v12, %v5895_v11 }
 0x471   :  { %v769_v17 = vpop.f32.mrb[6].mxu1  ;;  %932 = vmax.xlane.f32.xlu0 %v931_v16  ;;  %v937_v26 = vsel %vm318_vm2, %v5903_v15, -inf }
 0x472   :  { %v5912_v19 = vadd.f32 %v769_v17, %v5900_v14  ;;  %v4827_v20 = vpop.f32.mrb[7].mxu1  ;;  %v845_v21 = vpop.f32.mrb[6].mxu0 }
 0x473   :  { %v4832_v22 = vpop.f32.mrb[7].mxu0  ;;  %v5920_v24 = vadd.f32 %v845_v21, %v5909_v18 }
 0x474   :  { %v940_v25 = vsel %vm318_vm2, %v5912_v19, -inf }
 0x475   :  { %v921_v27 = vpop.f32.mrb[8].mxu1  ;;  %941 = vmax.xlane.f32.xlu1 %v940_v25  ;;  %938 = vmax.xlane.f32.xlu0 %v937_v26  ;;  %v943_v31 = vsel %vm318_vm2, %v5920_v24, -inf }
 0x476   :  { %v922_v28 = vadd.f32 %v921_v27, %v5917_v23  ;;  %v4837_v29 = vpop.f32.mrb[9].mxu1 }
 0x478   :  { %v946_v30 = vsel %vm318_vm2, %v922_v28, -inf }
 0x479   :  { %947 = vmax.xlane.f32.xlu1 %v946_v30  ;;  %944 = vmax.xlane.f32.xlu0 %v943_v31 }
 0x48a   :  { %1089 = vrot.lane.b32.xlu1 %v5773_v39, %s5516_s8 }
 0x48e   :  { %1165 = vrot.lane.b32.xlu1 %v5797_v43, %s5516_s8 }
 0x48f   :  { %1013 = vrot.lane.b32.xlu0 %v5775_v41, %s5516_s8 }
 0x490   :  { %v927_v32 = vpop.xlane.xlu0 %926 }
 0x491   :  { %v949_v34 = vsub.f32 %v390_v58, %v927_v32 }
 0x492   :  { %1241 = vrot.lane.b32.xlu1 %v5793_v42, %s5516_s8 }
 0x493   :  { %v957_v36 = vmul.f32 1.442695, %v949_v34 }
 0x495   :  { %5189 = vpow2.f32 %v957_v36 }
 0x497   :  { %v930_v38 = vpop.xlane.xlu1 %929 }
 0x498   :  { %v950_v40 = vsub.f32 %v466_v63, %v930_v38 }
 0x49a   :  { %v959_v47 = vmul.f32 1.442695, %v950_v40 }
 0x49c   :  { %5191 = vpow2.f32 %v959_v47 }
 0x49f   :  { %v5190_v49 = vpop.eup %5189 }
 0x4a0   :  { %v973_v39 = vsel %vm318_vm2, %v5190_v49, 0.0 }
 0x4a6   :  { %v5939_v50 = vpop.eup %5191 }
 0x4a7   :  { %v976_v41 = vsel %vm318_vm2, %v5939_v50, 0.0 }
 0x4ae   :  { %974 = vadd.xlane.f32.xlu0 %v973_v39 }
 0x4b6   :  { %977 = vadd.xlane.f32.xlu1 %v976_v41 }
 0x4fa   :  { %v936_v43 = vpop.xlane.xlu0 %935 }
 0x4fb   :  { %v952_v42 = vsub.f32 %v618_v5, %v936_v43 }
 0x4fd   :  { %v963_v51 = vmul.f32 1.442695, %v952_v42 }
 0x4fe   :  { %v933_v52 = vpop.xlane.xlu0 %932 }
 0x4ff   :  { %5193 = vpow2.f32 %v963_v51  ;;  %v951_v53 = vsub.f32 %v542_v9, %v933_v52 }
 0x501   :  { %v961_v54 = vmul.f32 1.442695, %v951_v53 }
 0x502   :  { %v942_v55 = vpop.xlane.xlu1 %941  ;;  %v939_v57 = vpop.xlane.xlu0 %938 }
 0x503   :  { %5195 = vpow2.f32 %v961_v54  ;;  %v954_v5 = vsub.f32 %v5912_v19, %v942_v55  ;;  %v953_v6 = vsub.f32 %v5903_v15, %v939_v57  ;;  %v1621_v55 = vld [vmem:[%s6414_s6] sm:$0xff] }
 0x505   :  { %v967_v7 = vmul.f32 1.442695, %v954_v5  ;;  %v965_v9 = vmul.f32 1.442695, %v953_v6 }
 0x506   :  { %v948_v58 = vpop.xlane.xlu1 %947  ;;  %v945_v59 = vpop.xlane.xlu0 %944 }
 0x507   :  { %v956_v8 = vsub.f32 %v922_v28, %v948_v58  ;;  %5197 = vpow2.f32 %v967_v7  ;;  %v955_v12 = vsub.f32 %v5920_v24, %v945_v59 }
 0x508   :  { %5199 = vpow2.f32 %v965_v9  ;;  %v1624_v9 = vld [vmem:[%s6414_s6 + $0x18] sm:$0xff] }
 0x509   :  { %v5943_v60 = vpop.eup %5193  ;;  %v971_v10 = vmul.f32 1.442695, %v956_v8  ;;  %v969_v13 = vmul.f32 1.442695, %v955_v12 }
 0x50a   :  { %v1090_v62 = vpop.permute.xlu1 %1089  ;;  %v1014_v63 = vpop.permute.xlu0 %1013  ;;  %v982_v0 = vsel %vm318_vm2, %v5943_v60, 0.0 }
 0x50b   :  { %4844 = vmatpush3.msra.mxu1 %v1090_v62  ;;  %983 = vadd.xlane.f32.xlu1 %v982_v0  ;;  %5201 = vpow2.f32 %v971_v10 }
 0x50c   :  { %4839 = vmatpush3.msra.mxu0 %v1014_v63  ;;  %4853 = vmatprep.subr.mxu1 %v5510_v37  ;;  %5203 = vpow2.f32 %v969_v13 }
 0x50d   :  { %v5196_v1 = vpop.eup %5195  ;;  %4848 = vmatprep.subr.mxu0 %v5510_v37 }
 0x50e   :  { %v979_v3 = vsel %vm318_vm2, %v5196_v1, 0.0  ;;  %v1166_v16 = vpop.permute.xlu1 %1165 }
 0x50f   :  { %980 = vadd.xlane.f32.xlu0 %v979_v3 }
 0x511   :  { %v5198_v17 = vpop.eup %5197 }
 0x512   :  { %v1242_v19 = vpop.permute.xlu1 %1241  ;;  %v988_v15 = vsel %vm318_vm2, %v5198_v17, 0.0 }
 0x51c   :  { %1393 = vrot.lane.b32.xlu1 %v5807_v46, %s5516_s8 }
 0x525   :  { %1317 = vrot.lane.b32.xlu0 %v5801_v44, %s5516_s8  ;;  %v5957_v44 = vpop.eup %5199 }
 0x526   :  { %v5202_v20 = vpop.eup %5201  ;;  %v985_v24 = vsel %vm318_vm2, %v5957_v44, 0.0 }
 0x527   :  { %v994_v22 = vsel %vm318_vm2, %v5202_v20, 0.0  ;;  %v5204_v25 = vpop.eup %5203 }
 0x528   :  { %v991_v28 = vsel %vm318_vm2, %v5204_v25, 0.0 }
 0x53b   :  { %v975_v46 = vpop.xlane.xlu0 %974 }
 0x53c   :  { %5205 = vrcp.f32 %v975_v46 }
 0x540   :  { %989 = vadd.xlane.f32.xlu1 %v988_v15  ;;  %v4568_v15 = vld [vmem:[#allocation8] ss:$0 sm:$0xff] }
 0x543   :  { %v978_v21 = vpop.xlane.xlu1 %977 }
 0x544   :  { %5207 = vrcp.f32 %v978_v21  ;;  %995 = vadd.xlane.f32.xlu1 %v994_v22  ;;  %986 = vadd.xlane.f32.xlu0 %v985_v24 }
 0x546   :  { %v5206_v26 = vpop.eup %5205 }
 0x547   :  { %v1005_v27 = vmul.f32 %v5206_v26, %v5190_v49 }
 0x548   :  { %992 = vadd.xlane.f32.xlu0 %v991_v28 }
 0x549   :  { %4841 = vmatmul.mubr.msk.f32.vlgmr.msra.gmra.mrb[8].mxu0 %vm318_vm2, %v1005_v27 }
 0x54a   :  { %4849 = vmatpush3.msra.mxu0 %v1166_v16  ;;  %4850 = vmatprep.mubr.msk.f32.mxu0 %vm5511_vm1, %v5510_v37 }
 0x54b   :  { %4858 = vmatprep.subr.mxu0 %v5510_v37 }
 0x54e   :  { %v5208_v29 = vpop.eup %5207 }
 0x54f   :  { %v1006_v30 = vmul.f32 %v5208_v29, %v5939_v50 }
 0x551   :  { %4846 = vmatmul.mubr.msk.f32.vlgmr.msra.gmra.mrb[10].mxu1 %vm318_vm2, %v1006_v30 }
 0x552   :  { %4854 = vmatpush3.msra.mxu1 %v1242_v19  ;;  %4855 = vmatprep.mubr.msk.f32.mxu1 %vm5511_vm1, %v5510_v37 }
 0x553   :  { %4863 = vmatprep.subr.mxu1 %v5510_v37 }
 0x555   :  { %1545 = vrot.lane.b32.xlu1 %v5815_v48, %s5516_s8 }
 0x55e   :  { %1469 = vrot.lane.b32.xlu0 %v5803_v45, %s5516_s8 }
 0x598   :  { %v984_v31 = vpop.xlane.xlu1 %983 }
 0x599   :  { %5209 = vrcp.f32 %v984_v31 }
 0x59c   :  { %v981_v32 = vpop.xlane.xlu0 %980  ;;  %v1394_v38 = vpop.permute.xlu1 %1393 }
 0x59d   :  { %5211 = vrcp.f32 %v981_v32 }
 0x5a0   :  { %v1318_v48 = vpop.permute.xlu0 %1317 }
 0x5a3   :  { %v5210_v34 = vpop.eup %5209 }
 0x5a4   :  { %v1008_v36 = vmul.f32 %v5210_v34, %v5943_v60  ;;  %v1622_v60 = vld [vmem:[%s6414_s6 + $0x8] sm:$0xff] }
 0x5a6   :  { %4856 = vmatmul.mubr.msk.f32.vlgmr.msra.gmra.mrb[12].mxu1 %vm318_vm2, %v1008_v36 }
 0x5a7   :  { %v5212_v40 = vpop.eup %5211  ;;  %4864 = vmatpush3.msra.mxu1 %v1394_v38  ;;  %4865 = vmatprep.mubr.msk.f32.mxu1 %vm5511_vm1, %v5510_v37 }
 0x5a8   :  { %v1007_v47 = vmul.f32 %v5212_v40, %v5196_v1  ;;  %4873 = vmatprep.subr.mxu1 %v5510_v37  ;;  %v1623_v1 = vld [vmem:[%s6414_s6 + $0x10] sm:$0xff] }
 0x5aa   :  { %4851 = vmatmul.mubr.msk.f32.vlgmr.msra.gmra.mrb[10].mxu0 %vm318_vm2, %v1007_v47 }
 0x5ab   :  { %4859 = vmatpush3.msra.mxu0 %v1318_v48  ;;  %4860 = vmatprep.mubr.msk.f32.mxu0 %vm5511_vm1, %v5510_v37  ;;  %v2011_v48 = vld [vmem:[#allocation13 + $0x8] sm:$0xff] }
 0x5ac   :  { %4868 = vmatprep.subr.mxu0 %v5510_v37 }
 0x5cd   :  { %v990_v45 = vpop.xlane.xlu1 %989 }
 0x5ce   :  { %5213 = vrcp.f32 %v990_v45 }
 0x5d1   :  { %v996_v49 = vpop.xlane.xlu1 %995  ;;  %v987_v39 = vpop.xlane.xlu0 %986 }
 0x5d2   :  { %5215 = vrcp.f32 %v996_v49  ;;  %v2012_v49 = vld [vmem:[#allocation13 + $0x10] sm:$0xff] }
 0x5d3   :  { %5217 = vrcp.f32 %v987_v39  ;;  %v2013_v39 = vld [vmem:[#allocation13 + $0x18] sm:$0xff] }
 0x5d5   :  { %v993_v50 = vpop.xlane.xlu0 %992  ;;  %v1546_v42 = vpop.permute.xlu1 %1545 }
 0x5d6   :  { %5219 = vrcp.f32 %v993_v50  ;;  %v5092_v50 = vpack.c.bf16 %v2013_v39, %v2012_v49 }
 0x5d8   :  { %v5214_v41 = vpop.eup %5213 }
 0x5d9   :  { %v1010_v43 = vmul.f32 %v5214_v41, %v5198_v17  ;;  %v1470_v58 = vpop.permute.xlu0 %1469 }
 0x5db   :  { %4866 = vmatmul.mubr.msk.f32.vlgmr.msra.gmra.mrb[14].mxu1 %vm318_vm2, %v1010_v43 }
 0x5dc   :  { %v5216_v51 = vpop.eup %5215  ;;  %4874 = vmatpush3.msra.mxu1 %v1546_v42  ;;  %4875 = vmatprep.mubr.msk.f32.mxu1 %vm5511_vm1, %v5510_v37 }
 0x5dd   :  { %v5218_v52 = vpop.eup %5217  ;;  %v1012_v53 = vmul.f32 %v5216_v51, %v5202_v20 }
 0x5de   :  { %v1009_v54 = vmul.f32 %v5218_v52, %v5957_v44 }
 0x5df   :  { %4876 = vmatmul.mubr.msk.f32.vlgmr.msra.gmra.mrb[16].mxu1 %vm318_vm2, %v1012_v53 }
 0x5e0   :  { %v5220_v57 = vpop.eup %5219  ;;  %4861 = vmatmul.mubr.msk.f32.vlgmr.msra.gmra.mrb[12].mxu0 %vm318_vm2, %v1009_v54 }
 0x5e1   :  { %v1011_v59 = vmul.f32 %v5220_v57, %v5204_v25  ;;  %4869 = vmatpush3.msra.mxu0 %v1470_v58  ;;  %4870 = vmatprep.mubr.msk.f32.mxu0 %vm5511_vm1, %v5510_v37  ;;  %v4570_v58 = vld [vmem:[#allocation11] ss:$0 sm:$0xff] }
 0x5e2   :  { %4878 = vmatprep.subr.mxu0 %v1621_v55 }
 0x5e4   :  { %4871 = vmatmul.mubr.msk.f32.vlgmr.msra.gmra.mrb[14].mxu0 %vm318_vm2, %v1011_v59 }
 0x5e5   :  { %4879 = vmatpush3.msra.mxu0 %v1621_v55  ;;  %v4569_v55 = vld [vmem:[#allocation10] ss:$0 sm:$0xff] }
 0x5e6   :  { %4883 = vmatprep.subr.mxu0 %v1622_v60 }
 0x61c   :  { %v1085_v62 = vpop.f32.mrb[8].mxu0 }
 0x61d   :  { %v4842_v63 = vpop.f32.mrb[9].mxu0  ;;  %4880 = vmatprep.mubr.msk.f32.mxu0 %vm318_vm2, %v1085_v62 }
 0x624   :  { %v1161_v0 = vpop.f32.mrb[10].mxu1 }
 0x625   :  { %v4847_v3 = vpop.f32.mrb[11].mxu1  ;;  %4881 = vmatmul.mubr.msk.f32.vlgmr.msra.gmra.mrb[16].mxu0 %vm318_vm2, %v1161_v0 }
 0x626   :  { %4884 = vmatpush3.msra.mxu0 %v1622_v60  ;;  %v2156_v3 = vld [vmem:[%s6420_s12] sm:$0xff] }
 0x627   :  { %4888 = vmatprep.subr.mxu0 %v1623_v1 }
 0x679   :  { %v1313_v5 = vpop.f32.mrb[12].mxu1 }
 0x67a   :  { %v4857_v6 = vpop.f32.mrb[13].mxu1 }
 0x67d   :  { %v1237_v7 = vpop.f32.mrb[10].mxu0 }
 0x67e   :  { %v4852_v8 = vpop.f32.mrb[11].mxu0  ;;  %4885 = vmatprep.mubr.msk.f32.mxu0 %vm318_vm2, %v1237_v7  ;;  %v2158_v7 = vld [vmem:[%s6420_s12 + $0x10] sm:$0xff] }
 0x67f   :  { %4886 = vmatmul.mubr.msk.f32.vlgmr.msra.gmra.mrb[16].mxu0 %vm318_vm2, %v1313_v5  ;;  %v2157_v5 = vld [vmem:[%s6420_s12 + $0x8] sm:$0xff]  ;;  %v2159_v8 = vld [vmem:[%s6420_s12 + $0x18] sm:$0xff] }
 0x680   :  { %4889 = vmatpush3.msra.mxu0 %v1623_v1  ;;  %v5096_v6 = vpack.c.bf16 %v2157_v5, %v2156_v3 }
 0x681   :  { %4893 = vmatprep.subr.mxu0 %v1624_v9 }
 0x6ae   :  { %v1465_v10 = vpop.f32.mrb[14].mxu1 }
 0x6af   :  { %v4867_v12 = vpop.f32.mrb[15].mxu1 }
 0x6b0   :  { %v2161_v12 = vld [vmem:[%s6420_s12 + $0x28] sm:$0xff] }
 0x6b2   :  { %v1617_v13 = vpop.f32.mrb[16].mxu1 }
 0x6b3   :  { %v1389_v16 = vpop.f32.mrb[12].mxu0  ;;  %v4877_v46 = vpop.f32.mrb[17].mxu1 }
 0x6b4   :  { %v4862_v17 = vpop.f32.mrb[13].mxu0  ;;  %4890 = vmatprep.mubr.msk.f32.mxu0 %vm318_vm2, %v1389_v16  ;;  %v2162_v16 = vld [vmem:[%s6420_s12 + $0x30] sm:$0xff]  ;;  %v2163_v46 = vld [vmem:[%s6420_s12 + $0x38] sm:$0xff] }
 0x6b5   :  { %4891 = vmatmul.mubr.msk.f32.vlgmr.msra.gmra.mrb[16].mxu0 %vm318_vm2, %v1465_v10  ;;  %v2160_v10 = vld [vmem:[%s6420_s12 + $0x20] sm:$0xff]  ;;  %v5108_v17 = vpack.c.bf16 %v2163_v46, %v2162_v16 }
 0x6b6   :  { %4894 = vmatpush3.msra.mxu0 %v1624_v9  ;;  %v5100_v9 = vpack.c.bf16 %v2159_v8, %v2158_v7  ;;  %v5517_v7 = vmov -1.0  }
 0x6b7   :  { %v1541_v44 = vpop.f32.mrb[14].mxu0 }
 0x6b8   :  { %v4872_v19 = vpop.f32.mrb[15].mxu0  ;;  %4895 = vmatprep.mubr.msk.f32.mxu0 %vm318_vm2, %v1541_v44  ;;  %v4571_v44 = vld [vmem:[%s6419_s11] ss:$0 sm:$0xff] }
 0x6bd   :  { %4896 = vmatmul.mubr.msk.f32.vlgmr.msra.gmra.mrb[16].mxu0 %vm318_vm2, %v1617_v13  ;;  %v5104_v13 = vpack.c.bf16 %v2161_v12, %v2160_v10 }
 0x790   :  { %v4897_v20 = vpop.f32.mrb[16].mxu0 }
 0x791   :  { %v1963_v21 = vadd.f32 %v4897_v20, %v4568_v15  ;;  %v1940_v22 = vpop.f32.mrb[17].mxu0 }
 0x792   :  { %v1962_v24 = vadd.f32 %v4568_v15, %v1940_v22 }
 0x793   :  { %v1965_v25 = vadd.f32 %v1963_v21, %v5760_v35 }
 0x794   :  { %v1964_v26 = vadd.f32 %v1962_v24, %v5756_v33  ;;  %v2010_v33 = vld [vmem:[#allocation13] sm:$0xff] }
 0x795   :  { %v1971_v27 = vsel %vm166_vm0, %v1965_v25, 0.0  ;;  %v5088_v45 = vpack.c.bf16 %v2011_v48, %v2010_v33 }
 0x796   :  { %1972 = vadd.xlane.f32.xlu1 %v1971_v27  ;;  %v1968_v28 = vsel %vm166_vm0, %v1964_v26, 0.0 }
 0x797   :  { %1969 = vadd.xlane.f32.xlu0 %v1968_v28  ;;  %5089 = vmatprep.subr.bf16.mxu1 %v5088_v45 }
 0x798   :  { %5091 = vmatpush3.bf16.msra.mxu1 %v5088_v45 }
 0x799   :  { %5093 = vmatprep.subr.bf16.mxu1 %v5092_v50 }
 0x79c   :  { %5095 = vmatpush3.bf16.msra.mxu1 %v5092_v50 }
 0x79d   :  { %5097 = vmatprep.subr.bf16.mxu1 %v5096_v6 }
 0x823   :  { %v1973_v29 = vpop.xlane.xlu1 %1972 }
 0x824   :  { %v1975_v30 = vmul.f32 0.03125, %v1973_v29  ;;  %v1970_v31 = vpop.xlane.xlu0 %1969 }
 0x825   :  { %v1974_v32 = vmul.f32 0.03125, %v1970_v31 }
 0x826   :  { %v1977_v34 = vsub.f32 %v1965_v25, %v1975_v30 }
 0x827   :  { %v1976_v36 = vsub.f32 %v1964_v26, %v1974_v32 }
 0x828   :  { %v1979_v47 = vmul.f32 %v1977_v34, %v1977_v34 }
 0x829   :  { %v1978_v38 = vmul.f32 %v1976_v36, %v1976_v36 }
 0x82a   :  { %v1983_v35 = vsel %vm166_vm0, %v1979_v47, 0.0 }
 0x82b   :  { %v1980_v40 = vsel %vm166_vm0, %v1978_v38, 0.0 }
 0x82c   :  { %1981 = vadd.xlane.f32.xlu0 %v1980_v40 }
 0x830   :  { %1984 = vadd.xlane.f32.xlu0 %v1983_v35 }
 0x8b9   :  { %v1982_v41 = vpop.xlane.xlu0 %1981 }
 0x8ba   :  { %v1986_v43 = vmul.f32 0.03125, %v1982_v41 }
 0x8bc   :  { %v1988_v42 = vadd.f32 1e-12, %v1986_v43 }
 0x8bd   :  { %v1985_v51 = vpop.xlane.xlu0 %1984 }
 0x8be   :  { %5221 = vrsqrt.f32 %v1988_v42  ;;  %v1987_v52 = vmul.f32 0.03125, %v1985_v51 }
 0x8c0   :  { %v1989_v53 = vadd.f32 1e-12, %v1987_v52 }
 0x8c2   :  { %5223 = vrsqrt.f32 %v1989_v53 }
 0x8c8   :  { %v5222_v54 = vpop.eup %5221 }
 0x8c9   :  { %v1992_v57 = vmul.f32 %v5222_v54, %v1976_v36 }
 0x8cb   :  { %v2000_v59 = vmul.f32 %v4569_v55, %v1992_v57 }
 0x8cc   :  { %v5224_v60 = vpop.eup %5223 }
 0x8cd   :  { %v1993_v62 = vmul.f32 %v5224_v60, %v1977_v34  ;;  %v6021_v63 = vadd.f32 %v4570_v58, %v2000_v59 }
 0x8cf   :  { %v2001_v0 = vmul.f32 %v4569_v55, %v1993_v62  ;;  %4906 = vmatprep.mubr.msk.f32.mxu1 %vm166_vm0, %v6021_v63 }
 0x8d1   :  { %v6025_v1 = vadd.f32 %v4570_v58, %v2001_v0 }
 0x8d3   :  { %4907 = vmatmul.mubr.msk.f32.vlgmr.msra.gmra.mrb[18].mxu1 %vm166_vm0, %v6025_v1 }
 0x8d4   :  { %5099 = vmatpush3.bf16.msra.mxu1 %v5096_v6 }
 0x8d5   :  { %5101 = vmatprep.subr.bf16.mxu1 %v5100_v9 }
 0x8d8   :  { %5103 = vmatpush3.bf16.msra.mxu1 %v5100_v9 }
 0x8d9   :  { %5105 = vmatprep.subr.bf16.mxu1 %v5104_v13 }
 0x8dc   :  { %5107 = vmatpush3.bf16.msra.mxu1 %v5104_v13 }
 0x8dd   :  { %5109 = vmatprep.subr.bf16.mxu1 %v5108_v17 }
 0x8e0   :  { %5111 = vmatpush3.bf16.msra.mxu1 %v5108_v17 }
 0x8e1   :  { %4944 = vmatprep.subr.mxu1 %v5510_v37 }
 0x9a6   :  { %v4908_v19 = vpop.f32.mrb[18].mxu1 }
 0x9a7   :  { %v2099_v15 = vadd.f32 %v4908_v19, %v4571_v44  ;;  %v2093_v20 = vpop.f32.mrb[19].mxu1 }
 0x9a8   :  { %v2094_v21 = vadd.f32 %v4571_v44, %v2093_v20 }
 0x9a9   :  { %v2105_v22 = vmul.f32 0.70710677, %v2099_v15  ;;  %v2103_v44 = vmul.f32 0.5, %v2099_v15 }
 0x9aa   :  { %v2104_v24 = vmul.f32 0.70710677, %v2094_v21  ;;  %v2102_v46 = vmul.f32 0.5, %v2094_v21 }
 0x9ab   :  { %v2111_v25 = vand.u32 2147483647, %v2105_v22  ;;  %vm2107_vm3 = vcmp.ge.f32.partialorder %v2105_v22, 0.0  ;;  %v4574_v22 = vld [vmem:[%s6421_s13] ss:$0 sm:$0xff] }
 0x9ac   :  { %v2110_v26 = vand.u32 2147483647, %v2104_v24  ;;  %vm2106_vm4 = vcmp.ge.f32.partialorder %v2104_v24, 0.0  ;;  %v2109_v8 = vsel %vm2107_vm3, 1.0, %v5517_v7 }
 0x9ad   :  { %v2113_v27 = vmul.f32 0.3275911, %v2111_v25  ;;  %v2139_v31 = vsub.f32 0.0, %v2111_v25  ;;  %v2108_v12 = vsel %vm2106_vm4, 1.0, %v5517_v7 }
 0x9ae   :  { %v2112_v28 = vmul.f32 0.3275911, %v2110_v26  ;;  %v2138_v32 = vsub.f32 0.0, %v2110_v26 }
 0x9af   :  { %v2115_v29 = vadd.f32 1.0, %v2113_v27  ;;  %v2141_v36 = vmul.f32 %v2139_v31, %v2111_v25 }
 0x9b0   :  { %v2114_v30 = vadd.f32 1.0, %v2112_v28  ;;  %v2140_v47 = vmul.f32 %v2138_v32, %v2110_v26 }
 0x9b1   :  { %5225 = vrcp.f32 %v2115_v29  ;;  %v2144_v48 = vmul.f32 1.442695, %v2141_v36 }
 0x9b2   :  { %5227 = vrcp.f32 %v2114_v30  ;;  %v2142_v39 = vmul.f32 1.442695, %v2140_v47 }
 0x9b3   :  { %5229 = vpow2.f32 %v2144_v48 }
 0x9b4   :  { %5231 = vpow2.f32 %v2142_v39 }
 0x9bb   :  { %v5226_v34 = vpop.eup %5225 }
 0x9bc   :  { %v5228_v38 = vpop.eup %5227  ;;  %v2121_v40 = vmul.f32 1.0614054, %v5226_v34 }
 0x9bd   :  { %v2120_v35 = vmul.f32 1.0614054, %v5228_v38  ;;  %v5230_v60 = vpop.eup %5229 }
 0x9be   :  { %v2123_v33 = vadd.f32 -1.4531521, %v2121_v40  ;;  %v5232_v0 = vpop.eup %5231 }
 0x9bf   :  { %v2122_v45 = vadd.f32 -1.4531521, %v2120_v35 }
 0x9c0   :  { %v2125_v49 = vmul.f32 %v5226_v34, %v2123_v33  ;;  %v4580_v33 = vld [vmem:[%s6412_s4 + $0x28] sm:$0xff] }
 0x9c1   :  { %v2124_v50 = vmul.f32 %v5228_v38, %v2122_v45  ;;  %v4581_v45 = vld [vmem:[%s6412_s4 + $0x30] sm:$0xff] }
 0x9c2   :  { %v2127_v41 = vadd.f32 1.4214138, %v2125_v49  ;;  %v4582_v49 = vld [vmem:[%s6412_s4 + $0x38] sm:$0xff] }
 0x9c3   :  { %v2126_v43 = vadd.f32 1.4214138, %v2124_v50  ;;  %v5116_v39 = vpack.c.bf16 %v4582_v49, %v4581_v45 }
 0x9c4   :  { %v2129_v42 = vmul.f32 %v5226_v34, %v2127_v41 }
 0x9c5   :  { %v2128_v51 = vmul.f32 %v5228_v38, %v2126_v43 }
 0x9c6   :  { %v2131_v52 = vadd.f32 -0.28449672, %v2129_v42 }
 0x9c7   :  { %v2130_v53 = vadd.f32 -0.28449672, %v2128_v51 }
 0x9c8   :  { %v2133_v54 = vmul.f32 %v5226_v34, %v2131_v52 }
 0x9c9   :  { %v2132_v55 = vmul.f32 %v5228_v38, %v2130_v53 }
 0x9ca   :  { %v2135_v57 = vadd.f32 0.2548296, %v2133_v54  ;;  %v4577_v54 = vld [vmem:[%s6422_s14] ss:$0 sm:$0xff] }
 0x9cb   :  { %v2134_v58 = vadd.f32 0.2548296, %v2132_v55 }
 0x9cc   :  { %v2137_v59 = vmul.f32 %v5226_v34, %v2135_v57 }
 0x9cd   :  { %v2136_v62 = vmul.f32 %v5228_v38, %v2134_v58 }
 0x9ce   :  { %v2147_v3 = vmul.f32 %v5230_v60, %v2137_v59  ;;  %v4578_v59 = vld [vmem:[%s6423_s15] ss:$0 sm:$0xff] }
 0x9cf   :  { %v2146_v5 = vmul.f32 %v5232_v0, %v2136_v62 }
 0x9d0   :  { %v2149_v6 = vsub.f32 1.0, %v2147_v3 }
 0x9d1   :  { %v2148_v9 = vsub.f32 1.0, %v2146_v5  ;;  %v4584_v5 = vld [vmem:[%s6413_s5 + $0x1] ss:$0 sm:$0xff] }
 0x9d2   :  { %v2151_v10 = vmul.f32 %v2149_v6, %v2109_v8 }
 0x9d3   :  { %v2150_v13 = vmul.f32 %v2148_v9, %v2108_v12 }
 0x9d4   :  { %v2153_v16 = vadd.f32 1.0, %v2151_v10 }
 0x9d5   :  { %v2152_v17 = vadd.f32 1.0, %v2150_v13 }
 0x9d6   :  { %v2155_v20 = vmul.f32 %v2153_v16, %v2103_v44 }
 0x9d7   :  { %v2154_v19 = vmul.f32 %v2152_v17, %v2102_v46 }
 0x9d9   :  { %4925 = vmatprep.mubr.msk.f32.mxu1 %vm2171_vm5, %v2154_v19 }
 0x9da   :  { %4926 = vmatmul.mubr.msk.f32.vlgmr.msra.gmra.mrb[20].mxu1 %vm2171_vm5, %v2155_v20 }
 0x9db   :  { %4946 = vmatprep.mubr.msk.f32.mxu1 %vm5511_vm1, %v5510_v37 }
 0xaad   :  { %v4927_v24 = vpop.f32.mrb[20].mxu1 }
 0xaae   :  { %v2250_v25 = vadd.f32 %v4927_v24, %v4574_v22  ;;  %v2244_v26 = vpop.f32.mrb[21].mxu1 }
 0xaaf   :  { %v2245_v21 = vadd.f32 %v4574_v22, %v2244_v26 }
 0xab0   :  { %v2254_v15 = vadd.f32 %v2250_v25, %v6025_v1 }
 0xab1   :  { %v2253_v27 = vadd.f32 %v2245_v21, %v6021_v63  ;;  %v4579_v63 = vld [vmem:[%s6412_s4 + $0x20] sm:$0xff] }
 0xab2   :  { %v2260_v28 = vsel %vm166_vm0, %v2254_v15, 0.0  ;;  %v5112_v48 = vpack.c.bf16 %v4580_v33, %v4579_v63 }
 0xab3   :  { %2261 = vadd.xlane.f32.xlu1 %v2260_v28  ;;  %v2257_v29 = vsel %vm166_vm0, %v2253_v27, 0.0 }
 0xab4   :  { %2258 = vadd.xlane.f32.xlu0 %v2257_v29  ;;  %5113 = vmatprep.subr.bf16.mxu0 %v5112_v48 }
 0xab5   :  { %5115 = vmatpush3.bf16.msra.mxu0 %v5112_v48 }
 0xab6   :  { %5117 = vmatprep.subr.bf16.mxu0 %v5116_v39 }
 0xab9   :  { %5119 = vmatpush3.bf16.msra.mxu0 %v5116_v39 }
 0xaba   :  { %4939 = vmatprep.subr.mxu0 %v5510_v37 }
 0xb40   :  { %v2262_v30 = vpop.xlane.xlu1 %2261 }
 0xb41   :  { %v2264_v31 = vmul.f32 0.03125, %v2262_v30  ;;  %v2259_v32 = vpop.xlane.xlu0 %2258 }
 0xb42   :  { %v2263_v34 = vmul.f32 0.03125, %v2259_v32 }
 0xb43   :  { %v2266_v36 = vsub.f32 %v2254_v15, %v2264_v31 }
 0xb44   :  { %v2265_v38 = vsub.f32 %v2253_v27, %v2263_v34 }
 0xb45   :  { %v2268_v40 = vmul.f32 %v2266_v36, %v2266_v36 }
 0xb46   :  { %v2267_v47 = vmul.f32 %v2265_v38, %v2265_v38 }
 0xb47   :  { %v2272_v35 = vsel %vm166_vm0, %v2268_v40, 0.0 }
 0xb48   :  { %2273 = vadd.xlane.f32.xlu1 %v2272_v35  ;;  %v2269_v1 = vsel %vm166_vm0, %v2267_v47, 0.0 }
 0xb49   :  { %2270 = vadd.xlane.f32.xlu0 %v2269_v1 }
 0xbd5   :  { %v2274_v50 = vpop.xlane.xlu1 %2273 }
 0xbd6   :  { %v2276_v41 = vmul.f32 0.03125, %v2274_v50  ;;  %v2271_v43 = vpop.xlane.xlu0 %2270 }
 0xbd7   :  { %v2275_v42 = vmul.f32 0.03125, %v2271_v43 }
 0xbd8   :  { %v2278_v51 = vadd.f32 1e-12, %v2276_v41 }
 0xbd9   :  { %v2277_v52 = vadd.f32 1e-12, %v2275_v42 }
 0xbda   :  { %5233 = vrsqrt.f32 %v2278_v51 }
 0xbdb   :  { %5235 = vrsqrt.f32 %v2277_v52 }
 0xbe4   :  { %v5234_v53 = vpop.eup %5233 }
 0xbe5   :  { %v5236_v55 = vpop.eup %5235  ;;  %v2282_v57 = vmul.f32 %v5234_v53, %v2266_v36 }
 0xbe6   :  { %v2281_v58 = vmul.f32 %v5236_v55, %v2265_v38 }
 0xbe7   :  { %v2290_v60 = vmul.f32 %v4577_v54, %v2282_v57 }
 0xbe8   :  { %v2289_v62 = vmul.f32 %v4577_v54, %v2281_v58 }
 0xbe9   :  { %v6093_v3 = vadd.f32 %v4578_v59, %v2290_v60 }
 0xbea   :  { %v6091_v0 = vadd.f32 %v4578_v59, %v2289_v62 }
 0xbec   :  { %4936 = vmatprep.mubr.msk.f32.mxu0 %vm166_vm0, %v6091_v0 }
 0xbed   :  { %4937 = vmatmul.mubr.msk.f32.vlgmr.msra.gmra.mrb[18].mxu0 %vm166_vm0, %v6093_v3 }
 0xbee   :  { %4941 = vmatprep.mubr.msk.f32.mxu0 %vm5511_vm1, %v5510_v37 }
 0xcc0   :  { %v4938_v6 = vpop.f32.mrb[18].mxu0 }
 0xcc1   :  { %v6104_v8 = vadd.f32 %v4938_v6, %v4584_v5  ;;  %v2384_v9 = vpop.f32.mrb[19].mxu0 }
 0xcc2   :  { %v6106_v10 = vadd.f32 %v4584_v5, %v2384_v9 }
 0xcc3   :  { %2397 = vrot.lane.b32.xlu1 %v6104_v8, %s5512_s28 }
 0xcc4   :  { %2395 = vrot.lane.b32.xlu0 %v6106_v10, %s5512_s28 }
 0xcc7   :  { %2399 = vrot.lane.b32.xlu1 %v6106_v10, %s5513_s20 }
 0xcc8   :  { %2403 = vrot.lane.b32.xlu0 %v6106_v10, %s5514_s30 }
 0xccb   :  { %2401 = vrot.lane.b32.xlu1 %v6104_v8, %s5513_s20 }
 0xccc   :  { %2407 = vrot.lane.b32.xlu0 %v6106_v10, %s5515_s2 }
 0xccf   :  { %2405 = vrot.lane.b32.xlu1 %v6104_v8, %s5514_s30 }
 0xcd3   :  { %2483 = vrot.lane.b32.xlu1 %v6104_v8, %s5515_s2 }
 0xd35   :  { %v6124_v12 = vpop.permute.xlu1 %2397 }
 0xd36   :  { %2635 = vrot.lane.b32.xlu1 %v6124_v12, %s5515_s2  ;;  %v6128_v13 = vpop.permute.xlu0 %2395 }
 0xd37   :  { %2559 = vrot.lane.b32.xlu0 %v6128_v13, %s5515_s2 }
 0xd39   :  { %v6132_v16 = vpop.permute.xlu1 %2399 }
 0xd3a   :  { %v6134_v46 = vpop.permute.xlu0 %2403 }
 0xd3b   :  { %2711 = vrot.lane.b32.xlu0 %v6132_v16, %s5515_s2 }
 0xd3d   :  { %v6138_v17 = vpop.permute.xlu1 %2401 }
 0xd3e   :  { %2787 = vrot.lane.b32.xlu1 %v6138_v17, %s5515_s2  ;;  %v2408_v44 = vpop.permute.xlu0 %2407 }
 0xd3f   :  { %2863 = vrot.lane.b32.xlu0 %v6134_v46, %s5515_s2  ;;  %4940 = vmatpush3.xpose.msk.msra.mxu0 %vm318_vm2, %v2408_v44 }
 0xd40   :  { %4949 = vmatprep.subr.mxu0 %v5510_v37 }
 0xd41   :  { %v6146_v19 = vpop.permute.xlu1 %2405 }
 0xd42   :  { %2939 = vrot.lane.b32.xlu1 %v6146_v19, %s5515_s2  ;;  %4942 = vmatmul.mubr.msk.f32.vlgmr.msra.gmra.mrb[20].mxu0 %vm318_vm2, %v6106_v10 }
 0xd43   :  { %4951 = vmatprep.mubr.msk.f32.mxu0 %vm5511_vm1, %v5510_v37 }
 0xd45   :  { %v2484_v20 = vpop.permute.xlu1 %2483 }
 0xd46   :  { %4945 = vmatpush3.xpose.msk.msra.mxu1 %vm318_vm2, %v2484_v20 }
 0xd47   :  { %4954 = vmatprep.subr.mxu1 %v5510_v37 }
 0xd49   :  { %4947 = vmatmul.mubr.msk.f32.vlgmr.msra.gmra.mrb[22].mxu1 %vm318_vm2, %v6104_v8 }
 0xd4a   :  { %4956 = vmatprep.mubr.msk.f32.mxu1 %vm5511_vm1, %v5510_v37 }
 0xda8   :  { %v2636_v22 = vpop.permute.xlu1 %2635 }
 0xda9   :  { %4955 = vmatpush3.xpose.msk.msra.mxu1 %vm318_vm2, %v2636_v22  ;;  %v2560_v24 = vpop.permute.xlu0 %2559 }
 0xdaa   :  { %4950 = vmatpush3.xpose.msk.msra.mxu0 %vm318_vm2, %v2560_v24  ;;  %4964 = vmatprep.subr.mxu1 %v5510_v37 }
 0xdab   :  { %4959 = vmatprep.subr.mxu0 %v5510_v37 }
 0xdac   :  { %4957 = vmatmul.mubr.msk.f32.vlgmr.msra.gmra.mrb[24].mxu1 %vm318_vm2, %v6124_v12 }
 0xdad   :  { %4952 = vmatmul.mubr.msk.f32.vlgmr.msra.gmra.mrb[22].mxu0 %vm318_vm2, %v6128_v13  ;;  %v2712_v25 = vpop.permute.xlu0 %2711  ;;  %4966 = vmatprep.mubr.msk.f32.mxu1 %vm5511_vm1, %v5510_v37 }
 0xdae   :  { %4960 = vmatpush3.xpose.msk.msra.mxu0 %vm318_vm2, %v2712_v25  ;;  %4961 = vmatprep.mubr.msk.f32.mxu0 %vm5511_vm1, %v5510_v37 }
 0xdaf   :  { %4969 = vmatprep.subr.mxu0 %v5510_v37 }
 0xdb0   :  { %v2788_v26 = vpop.permute.xlu1 %2787 }
 0xdb1   :  { %4962 = vmatmul.mubr.msk.f32.vlgmr.msra.gmra.mrb[24].mxu0 %vm318_vm2, %v6132_v16  ;;  %4965 = vmatpush3.xpose.msk.msra.mxu1 %vm318_vm2, %v2788_v26  ;;  %v2864_v21 = vpop.permute.xlu0 %2863 }
 0xdb2   :  { %4970 = vmatpush3.xpose.msk.msra.mxu0 %vm318_vm2, %v2864_v21  ;;  %4974 = vmatprep.subr.mxu1 %v5510_v37 }
 0xdb3   :  { %4971 = vmatprep.mubr.msk.f32.mxu0 %vm5511_vm1, %v5510_v37  ;;  %4979 = vmatprep.subr.mxu0 %v5510_v37 }
 0xdb4   :  { %4967 = vmatmul.mubr.msk.f32.vlgmr.msra.gmra.mrb[26].mxu1 %vm318_vm2, %v6138_v17  ;;  %v2940_v15 = vpop.permute.xlu1 %2939 }
 0xdb5   :  { %4972 = vmatmul.mubr.msk.f32.vlgmr.msra.gmra.mrb[26].mxu0 %vm318_vm2, %v6134_v46  ;;  %4975 = vmatpush3.xpose.msk.msra.mxu1 %vm318_vm2, %v2940_v15 }
 0xdb6   :  { %4976 = vmatprep.mubr.msk.f32.mxu1 %vm5511_vm1, %v5510_v37  ;;  %4984 = vmatprep.subr.mxu1 %v5510_v37 }
 0xdb7   :  { %4981 = vmatprep.mubr.msk.f32.mxu0 %vm5511_vm1, %v5510_v37 }
 0xdb8   :  { %4977 = vmatmul.mubr.msk.f32.vlgmr.msra.gmra.mrb[28].mxu1 %vm318_vm2, %v6146_v19 }
 0xdb9   :  { %4986 = vmatprep.mubr.msk.f32.mxu1 %vm5511_vm1, %v5510_v37 }
 0xe15   :  { %v2479_v27 = vpop.f32.mrb[20].mxu0 }
 0xe16   :  { %v2480_v28 = vadd.f32 %v2479_v27, %v5868_v56  ;;  %v4943_v29 = vpop.f32.mrb[21].mxu0 }
 0xe18   :  { %v3015_v30 = vsel %vm318_vm2, %v2480_v28, -inf }
 0xe19   :  { %3016 = vmax.xlane.f32.xlu0 %v3015_v30 }
 0xe1c   :  { %v2555_v31 = vpop.f32.mrb[22].mxu1 }
 0xe1d   :  { %v2556_v32 = vadd.f32 %v2555_v31, %v5875_v61  ;;  %v4948_v34 = vpop.f32.mrb[23].mxu1 }
 0xe1f   :  { %v3018_v36 = vsel %vm318_vm2, %v2556_v32, -inf }
 0xe20   :  { %3019 = vmax.xlane.f32.xlu1 %v3018_v36 }
 0xe7f   :  { %v2707_v38 = vpop.f32.mrb[24].mxu1 }
 0xe80   :  { %v2708_v40 = vadd.f32 %v2707_v38, %v5882_v2  ;;  %v2631_v47 = vpop.f32.mrb[22].mxu0  ;;  %v4958_v35 = vpop.f32.mrb[25].mxu1 }
 0xe81   :  { %v4953_v1 = vpop.f32.mrb[23].mxu0  ;;  %v2632_v63 = vadd.f32 %v2631_v47, %v5887_v4 }
 0xe82   :  { %v3024_v56 = vsel %vm318_vm2, %v2708_v40, -inf }
 0xe83   :  { %3025 = vmax.xlane.f32.xlu0 %v3024_v56  ;;  %v3021_v61 = vsel %vm318_vm2, %v2632_v63, -inf }
 0xe84   :  { %v2783_v33 = vpop.f32.mrb[24].mxu0 }
 0xe85   :  { %v4963_v48 = vpop.f32.mrb[25].mxu0  ;;  %v6204_v45 = vadd.f32 %v2783_v33, %v5895_v11 }
 0xe87   :  { %v2859_v49 = vpop.f32.mrb[26].mxu1  ;;  %3022 = vmax.xlane.f32.xlu0 %v3021_v61  ;;  %v3027_v42 = vsel %vm318_vm2, %v6204_v45, -inf }
 0xe88   :  { %v2860_v39 = vadd.f32 %v2859_v49, %v5900_v14  ;;  %v4968_v2 = vpop.f32.mrb[27].mxu1  ;;  %v2935_v50 = vpop.f32.mrb[26].mxu0 }
 0xe89   :  { %v4973_v41 = vpop.f32.mrb[27].mxu0  ;;  %v6209_v43 = vadd.f32 %v2935_v50, %v5909_v18 }
 0xe8a   :  { %v3030_v4 = vsel %vm318_vm2, %v2860_v39, -inf }
 0xe8b   :  { %3031 = vmax.xlane.f32.xlu1 %v3030_v4  ;;  %v3011_v11 = vpop.f32.mrb[28].mxu1  ;;  %3028 = vmax.xlane.f32.xlu0 %v3027_v42  ;;  %v3033_v14 = vsel %vm318_vm2, %v6209_v43, -inf }
 0xe8c   :  { %v3012_v51 = vadd.f32 %v3011_v11, %v5917_v23  ;;  %v4978_v52 = vpop.f32.mrb[29].mxu1 }
 0xe8e   :  { %v3036_v53 = vsel %vm318_vm2, %v3012_v51, -inf }
 0xe8f   :  { %3037 = vmax.xlane.f32.xlu1 %v3036_v53  ;;  %3034 = vmax.xlane.f32.xlu0 %v3033_v14 }
 0xea0   :  { %3179 = vrot.lane.b32.xlu1 %v6104_v8, %s5516_s8 }
 0xea4   :  { %3255 = vrot.lane.b32.xlu1 %v6128_v13, %s5516_s8 }
 0xea5   :  { %3103 = vrot.lane.b32.xlu0 %v6106_v10, %s5516_s8 }
 0xea6   :  { %v3017_v18 = vpop.xlane.xlu0 %3016 }
 0xea7   :  { %v3039_v23 = vsub.f32 %v2480_v28, %v3017_v18 }
 0xea8   :  { %3331 = vrot.lane.b32.xlu1 %v6124_v12, %s5516_s8 }
 0xea9   :  { %v3047_v54 = vmul.f32 1.442695, %v3039_v23 }
 0xeab   :  { %5237 = vpow2.f32 %v3047_v54 }
 0xead   :  { %v3020_v55 = vpop.xlane.xlu1 %3019 }
 0xeae   :  { %v3040_v57 = vsub.f32 %v2556_v32, %v3020_v55 }
 0xeb0   :  { %v3049_v58 = vmul.f32 1.442695, %v3040_v57 }
 0xeb2   :  { %5239 = vpow2.f32 %v3049_v58 }
 0xeb5   :  { %v5238_v59 = vpop.eup %5237 }
 0xeb6   :  { %v3063_v60 = vsel %vm318_vm2, %v5238_v59, 0.0 }
 0xebc   :  { %v6227_v62 = vpop.eup %5239 }
 0xebd   :  { %v3066_v5 = vsel %vm318_vm2, %v6227_v62, 0.0 }
 0xec4   :  { %3064 = vadd.xlane.f32.xlu0 %v3063_v60 }
 0xecc   :  { %3067 = vadd.xlane.f32.xlu1 %v3066_v5  ;;  %v4611_v5 = vld [vmem:[%s6414_s6 + $0x20] sm:$0xff] }
 0xf10   :  { %v3026_v6 = vpop.xlane.xlu0 %3025 }
 0xf11   :  { %v3042_v8 = vsub.f32 %v2708_v40, %v3026_v6 }
 0xf13   :  { %v3053_v9 = vmul.f32 1.442695, %v3042_v8 }
 0xf14   :  { %v3023_v10 = vpop.xlane.xlu0 %3022 }
 0xf15   :  { %5241 = vpow2.f32 %v3053_v9  ;;  %v3041_v12 = vsub.f32 %v2632_v63, %v3023_v10  ;;  %v4612_v10 = vld [vmem:[%s6414_s6 + $0x28] sm:$0xff] }
 0xf17   :  { %v3051_v13 = vmul.f32 1.442695, %v3041_v12 }
 0xf18   :  { %v3032_v44 = vpop.xlane.xlu1 %3031  ;;  %v3029_v20 = vpop.xlane.xlu0 %3028 }
 0xf19   :  { %5243 = vpow2.f32 %v3051_v13  ;;  %v3044_v29 = vsub.f32 %v2860_v39, %v3032_v44  ;;  %v3043_v30 = vsub.f32 %v6204_v45, %v3029_v20  ;;  %v4613_v20 = vld [vmem:[%s6414_s6 + $0x30] sm:$0xff] }
 0xf1b   :  { %v3057_v31 = vmul.f32 1.442695, %v3044_v29  ;;  %v3055_v34 = vmul.f32 1.442695, %v3043_v30 }
 0xf1c   :  { %v3038_v22 = vpop.xlane.xlu1 %3037  ;;  %v3035_v24 = vpop.xlane.xlu0 %3034 }
 0xf1d   :  { %v3046_v32 = vsub.f32 %v3012_v51, %v3038_v22  ;;  %5245 = vpow2.f32 %v3057_v31  ;;  %v3045_v38 = vsub.f32 %v6209_v43, %v3035_v24 }
 0xf1e   :  { %5247 = vpow2.f32 %v3055_v34 }
 0xf1f   :  { %v6231_v25 = vpop.eup %5241  ;;  %v3061_v36 = vmul.f32 1.442695, %v3046_v32  ;;  %v3059_v40 = vmul.f32 1.442695, %v3045_v38 }
 0xf20   :  { %v3180_v26 = vpop.permute.xlu1 %3179  ;;  %v3104_v21 = vpop.permute.xlu0 %3103  ;;  %v3072_v15 = vsel %vm318_vm2, %v6231_v25, 0.0 }
 0xf21   :  { %4985 = vmatpush3.msra.mxu1 %v3180_v26  ;;  %3073 = vadd.xlane.f32.xlu1 %v3072_v15  ;;  %5249 = vpow2.f32 %v3061_v36  ;;  %v4623_v36 = vld [vmem:[#allocation8 + $0x1] ss:$0 sm:$0xff] }
 0xf22   :  { %4980 = vmatpush3.msra.mxu0 %v3104_v21  ;;  %4994 = vmatprep.subr.mxu1 %v5510_v37  ;;  %5251 = vpow2.f32 %v3059_v40  ;;  %v4614_v21 = vld [vmem:[%s6414_s6 + $0x38] sm:$0xff] }
 0xf23   :  { %v5244_v27 = vpop.eup %5243  ;;  %4989 = vmatprep.subr.mxu0 %v5510_v37 }
 0xf24   :  { %v3069_v28 = vsel %vm318_vm2, %v5244_v27, 0.0  ;;  %v3256_v47 = vpop.permute.xlu1 %3255 }
 0xf25   :  { %3070 = vadd.xlane.f32.xlu0 %v3069_v28 }
 0xf32   :  { %3483 = vrot.lane.b32.xlu1 %v6138_v17, %s5516_s8  ;;  %v5246_v17 = vpop.eup %5245 }
 0xf33   :  { %v6244_v1 = vpop.eup %5247  ;;  %v3078_v63 = vsel %vm318_vm2, %v5246_v17, 0.0 }
 0xf34   :  { %v5250_v56 = vpop.eup %5249  ;;  %v3075_v45 = vsel %vm318_vm2, %v6244_v1, 0.0 }
 0xf35   :  { %v3084_v48 = vsel %vm318_vm2, %v5250_v56, 0.0  ;;  %v5252_v61 = vpop.eup %5251 }
 0xf36   :  { %v3081_v2 = vsel %vm318_vm2, %v5252_v61, 0.0 }
 0xf3b   :  { %3407 = vrot.lane.b32.xlu0 %v6132_v16, %s5516_s8  ;;  %v3332_v16 = vpop.permute.xlu1 %3331 }
 0xf51   :  { %v3065_v35 = vpop.xlane.xlu0 %3064 }
 0xf52   :  { %5253 = vrcp.f32 %v3065_v35 }
 0xf56   :  { %3079 = vadd.xlane.f32.xlu1 %v3078_v63 }
 0xf59   :  { %v3068_v33 = vpop.xlane.xlu1 %3067 }
 0xf5a   :  { %5255 = vrcp.f32 %v3068_v33  ;;  %3085 = vadd.xlane.f32.xlu1 %v3084_v48  ;;  %3076 = vadd.xlane.f32.xlu0 %v3075_v45 }
 0xf5c   :  { %v5254_v49 = vpop.eup %5253 }
 0xf5d   :  { %v3095_v39 = vmul.f32 %v5254_v49, %v5238_v59 }
 0xf5e   :  { %3082 = vadd.xlane.f32.xlu0 %v3081_v2 }
 0xf5f   :  { %4982 = vmatmul.mubr.msk.f32.vlgmr.msra.gmra.mrb[28].mxu0 %vm318_vm2, %v3095_v39 }
 0xf60   :  { %4990 = vmatpush3.msra.mxu0 %v3256_v47  ;;  %4991 = vmatprep.mubr.msk.f32.mxu0 %vm5511_vm1, %v5510_v37 }
 0xf61   :  { %4999 = vmatprep.subr.mxu0 %v5510_v37 }
 0xf64   :  { %v5256_v50 = vpop.eup %5255 }
 0xf65   :  { %v3096_v41 = vmul.f32 %v5256_v50, %v6227_v62 }
 0xf67   :  { %4987 = vmatmul.mubr.msk.f32.vlgmr.msra.gmra.mrb[30].mxu1 %vm318_vm2, %v3096_v41  ;;  %v4106_v41 = vld [vmem:[#allocation13 + $0x28] sm:$0xff] }
 0xf68   :  { %4995 = vmatpush3.msra.mxu1 %v3332_v16  ;;  %4996 = vmatprep.mubr.msk.f32.mxu1 %vm5511_vm1, %v5510_v37 }
 0xf69   :  { %5004 = vmatprep.subr.mxu1 %v5510_v37 }
 0xf6b   :  { %3635 = vrot.lane.b32.xlu1 %v6146_v19, %s5516_s8 }
 0xf74   :  { %3559 = vrot.lane.b32.xlu0 %v6134_v46, %s5516_s8 }
 0xfae   :  { %v3074_v43 = vpop.xlane.xlu1 %3073 }
 0xfaf   :  { %5257 = vrcp.f32 %v3074_v43 }
 0xfb2   :  { %v3071_v4 = vpop.xlane.xlu0 %3070  ;;  %v3484_v51 = vpop.permute.xlu1 %3483 }
 0xfb3   :  { %5259 = vrcp.f32 %v3071_v4  ;;  %v4107_v4 = vld [vmem:[#allocation13 + $0x30] sm:$0xff] }
 0xfb6   :  { %v3408_v19 = vpop.permute.xlu0 %3407 }
 0xfb9   :  { %v5258_v42 = vpop.eup %5257 }
 0xfba   :  { %v3098_v11 = vmul.f32 %v5258_v42, %v6231_v25  ;;  %v4108_v42 = vld [vmem:[#allocation13 + $0x38] sm:$0xff] }
 0xfbc   :  { %4997 = vmatmul.mubr.msk.f32.vlgmr.msra.gmra.mrb[32].mxu1 %vm318_vm2, %v3098_v11  ;;  %v5124_v11 = vpack.c.bf16 %v4108_v42, %v4107_v4 }
 0xfbd   :  { %v5260_v52 = vpop.eup %5259  ;;  %5005 = vmatpush3.msra.mxu1 %v3484_v51  ;;  %5006 = vmatprep.mubr.msk.f32.mxu1 %vm5511_vm1, %v5510_v37 }
 0xfbe   :  { %v3097_v53 = vmul.f32 %v5260_v52, %v5244_v27  ;;  %5014 = vmatprep.subr.mxu1 %v5510_v37 }
 0xfc0   :  { %4992 = vmatmul.mubr.msk.f32.vlgmr.msra.gmra.mrb[30].mxu0 %vm318_vm2, %v3097_v53 }
 0xfc1   :  { %5000 = vmatpush3.msra.mxu0 %v3408_v19  ;;  %5001 = vmatprep.mubr.msk.f32.mxu0 %vm5511_vm1, %v5510_v37 }
 0xfc2   :  { %5009 = vmatprep.subr.mxu0 %v5510_v37 }
 0xfe3   :  { %v3080_v46 = vpop.xlane.xlu1 %3079 }
 0xfe4   :  { %5261 = vrcp.f32 %v3080_v46 }
 0xfe7   :  { %v3086_v14 = vpop.xlane.xlu1 %3085  ;;  %v3077_v18 = vpop.xlane.xlu0 %3076 }
 0xfe8   :  { %5263 = vrcp.f32 %v3086_v14 }
 0xfe9   :  { %5265 = vrcp.f32 %v3077_v18 }
 0xfeb   :  { %v3083_v23 = vpop.xlane.xlu0 %3082  ;;  %v3636_v57 = vpop.permute.xlu1 %3635 }
 0xfec   :  { %5267 = vrcp.f32 %v3083_v23  ;;  %v4624_v23 = vld [vmem:[#allocation10 + $0x1] ss:$0 sm:$0xff] }
 0xfee   :  { %v5262_v54 = vpop.eup %5261 }
 0xfef   :  { %v3100_v55 = vmul.f32 %v5262_v54, %v5246_v17  ;;  %v3560_v8 = vpop.permute.xlu0 %3559 }
 0xff1   :  { %5007 = vmatmul.mubr.msk.f32.vlgmr.msra.gmra.mrb[34].mxu1 %vm318_vm2, %v3100_v55  ;;  %v4625_v55 = vld [vmem:[#allocation11 + $0x1] ss:$0 sm:$0xff] }
 0xff2   :  { %v5264_v58 = vpop.eup %5263  ;;  %5015 = vmatpush3.msra.mxu1 %v3636_v57  ;;  %5016 = vmatprep.mubr.msk.f32.mxu1 %vm5511_vm1, %v5510_v37 }
 0xff3   :  { %v5266_v59 = vpop.eup %5265  ;;  %v3102_v60 = vmul.f32 %v5264_v58, %v5250_v56 }
 0xff4   :  { %v3099_v62 = vmul.f32 %v5266_v59, %v6244_v1 }
 0xff5   :  { %5017 = vmatmul.mubr.msk.f32.vlgmr.msra.gmra.mrb[36].mxu1 %vm318_vm2, %v3102_v60 }
 0xff6   :  { %v5268_v6 = vpop.eup %5267  ;;  %5002 = vmatmul.mubr.msk.f32.vlgmr.msra.gmra.mrb[32].mxu0 %vm318_vm2, %v3099_v62 }
 0xff7   :  { %v3101_v9 = vmul.f32 %v5268_v6, %v5252_v61  ;;  %5010 = vmatpush3.msra.mxu0 %v3560_v8  ;;  %5011 = vmatprep.mubr.msk.f32.mxu0 %vm5511_vm1, %v5510_v37  ;;  %v4630_v6 = vld [vmem:[%s6420_s12 + $0x40] sm:$0xff]  ;;  %v4631_v8 = vld [vmem:[%s6420_s12 + $0x48] sm:$0xff] }
 0xff8   :  { %5019 = vmatprep.subr.mxu0 %v4611_v5 }
 0xffa   :  { %5012 = vmatmul.mubr.msk.f32.vlgmr.msra.gmra.mrb[34].mxu0 %vm318_vm2, %v3101_v9  ;;  %v5128_v9 = vpack.c.bf16 %v4631_v8, %v4630_v6 }
 0xffb   :  { %5020 = vmatpush3.msra.mxu0 %v4611_v5 }
 0xffc   :  { %5024 = vmatprep.subr.mxu0 %v4612_v10 }
0x1032   :  { %v3175_v12 = vpop.f32.mrb[28].mxu0 }
0x1033   :  { %v4983_v13 = vpop.f32.mrb[29].mxu0  ;;  %5021 = vmatprep.mubr.msk.f32.mxu0 %vm318_vm2, %v3175_v12  ;;  %v4633_v12 = vld [vmem:[%s6420_s12 + $0x58] sm:$0xff] }
0x103a   :  { %v3251_v44 = vpop.f32.mrb[30].mxu1 }
0x103b   :  { %v4988_v22 = vpop.f32.mrb[31].mxu1  ;;  %5022 = vmatmul.mubr.msk.f32.vlgmr.msra.gmra.mrb[36].mxu0 %vm318_vm2, %v3251_v44  ;;  %v4634_v44 = vld [vmem:[%s6420_s12 + $0x60] sm:$0xff] }
0x103c   :  { %5025 = vmatpush3.msra.mxu0 %v4612_v10  ;;  %v4632_v10 = vld [vmem:[%s6420_s12 + $0x50] sm:$0xff] }
0x103d   :  { %5029 = vmatprep.subr.mxu0 %v4613_v20  ;;  %v5132_v13 = vpack.c.bf16 %v4633_v12, %v4632_v10 }
0x108f   :  { %v3403_v37 = vpop.f32.mrb[32].mxu1 }
0x1090   :  { %v4998_v24 = vpop.f32.mrb[33].mxu1 }
0x1091   :  { %v4637_v24 = vld [vmem:[%s6420_s12 + $0x78] sm:$0xff] }
0x1093   :  { %v3327_v25 = vpop.f32.mrb[30].mxu0 }
0x1094   :  { %v4993_v26 = vpop.f32.mrb[31].mxu0  ;;  %5026 = vmatprep.mubr.msk.f32.mxu0 %vm318_vm2, %v3327_v25 }
0x1095   :  { %5027 = vmatmul.mubr.msk.f32.vlgmr.msra.gmra.mrb[36].mxu0 %vm318_vm2, %v3403_v37  ;;  %v4636_v37 = vld [vmem:[%s6420_s12 + $0x70] sm:$0xff]  ;;  %v4627_v26 = vld [vmem:[%s6419_s11 + $0x1] ss:$0 sm:$0xff] }
0x1096   :  { %5030 = vmatpush3.msra.mxu0 %v4613_v20  ;;  %v4635_v20 = vld [vmem:[%s6420_s12 + $0x68] sm:$0xff]  ;;  %v5140_v25 = vpack.c.bf16 %v4637_v24, %v4636_v37 }
0x1097   :  { %5034 = vmatprep.subr.mxu0 %v4614_v21  ;;  %v5136_v22 = vpack.c.bf16 %v4635_v20, %v4634_v44  ;;  %v4639_v44 = vld [vmem:[%s6421_s13 + $0x1] ss:$0 sm:$0xff] }
0x10c4   :  { %v3555_v15 = vpop.f32.mrb[34].mxu1 }
0x10c5   :  { %v5008_v27 = vpop.f32.mrb[35].mxu1 }
0x10c8   :  { %v3707_v28 = vpop.f32.mrb[36].mxu1 }
0x10c9   :  { %v3479_v29 = vpop.f32.mrb[32].mxu0  ;;  %v5018_v30 = vpop.f32.mrb[37].mxu1 }
0x10ca   :  { %v5003_v31 = vpop.f32.mrb[33].mxu0  ;;  %5031 = vmatprep.mubr.msk.f32.mxu0 %vm318_vm2, %v3479_v29 }
0x10cb   :  { %5032 = vmatmul.mubr.msk.f32.vlgmr.msra.gmra.mrb[36].mxu0 %vm318_vm2, %v3555_v15 }
0x10cc   :  { %5035 = vmatpush3.msra.mxu0 %v4614_v21 }
0x10cd   :  { %v3631_v32 = vpop.f32.mrb[34].mxu0 }
0x10ce   :  { %v5013_v34 = vpop.f32.mrb[35].mxu0  ;;  %5036 = vmatprep.mubr.msk.f32.mxu0 %vm318_vm2, %v3631_v32 }
0x10d3   :  { %5037 = vmatmul.mubr.msk.f32.vlgmr.msra.gmra.mrb[36].mxu0 %vm318_vm2, %v3707_v28 }
0x11a6   :  { %v5038_v38 = vpop.f32.mrb[36].mxu0 }
0x11a7   :  { %v4055_v40 = vadd.f32 %v5038_v38, %v4623_v36  ;;  %v4031_v47 = vpop.f32.mrb[37].mxu0 }
0x11a8   :  { %v4054_v35 = vadd.f32 %v4623_v36, %v4031_v47 }
0x11a9   :  { %v4057_v17 = vadd.f32 %v4055_v40, %v6093_v3 }
0x11aa   :  { %v4056_v1 = vadd.f32 %v4054_v35, %v6091_v0  ;;  %v4105_v0 = vld [vmem:[#allocation13 + $0x20] sm:$0xff] }
0x11ab   :  { %v4065_v16 = vsel %vm166_vm0, %v4057_v17, 0.0  ;;  %v5120_v43 = vpack.c.bf16 %v4106_v41, %v4105_v0 }
0x11ac   :  { %4066 = vadd.xlane.f32.xlu1 %v4065_v16  ;;  %v4062_v63 = vsel %vm166_vm0, %v4056_v1, 0.0 }
0x11ad   :  { %4063 = vadd.xlane.f32.xlu0 %v4062_v63  ;;  %5121 = vmatprep.subr.bf16.mxu1 %v5120_v43 }
0x11ae   :  { %5123 = vmatpush3.bf16.msra.mxu1 %v5120_v43 }
0x11af   :  { %5125 = vmatprep.subr.bf16.mxu1 %v5124_v11 }
0x11b2   :  { %5127 = vmatpush3.bf16.msra.mxu1 %v5124_v11 }
0x11b3   :  { %5129 = vmatprep.subr.bf16.mxu1 %v5128_v9 }
0x1239   :  { %v4067_v56 = vpop.xlane.xlu1 %4066 }
0x123a   :  { %v4069_v33 = vmul.f32 0.03125, %v4067_v56  ;;  %v4064_v48 = vpop.xlane.xlu0 %4063 }
0x123b   :  { %v4068_v45 = vmul.f32 0.03125, %v4064_v48 }
0x123c   :  { %v4071_v61 = vsub.f32 %v4057_v17, %v4069_v33 }
0x123d   :  { %v4070_v49 = vsub.f32 %v4056_v1, %v4068_v45 }
0x123e   :  { %v4073_v50 = vmul.f32 %v4071_v61, %v4071_v61 }
0x123f   :  { %v4072_v39 = vmul.f32 %v4070_v49, %v4070_v49 }
0x1240   :  { %v4077_v3 = vsel %vm166_vm0, %v4073_v50, 0.0 }
0x1241   :  { %v4074_v2 = vsel %vm166_vm0, %v4072_v39, 0.0 }
0x1242   :  { %4075 = vadd.xlane.f32.xlu0 %v4074_v2 }
0x1246   :  { %4078 = vadd.xlane.f32.xlu0 %v4077_v3 }
0x12cf   :  { %v4076_v51 = vpop.xlane.xlu0 %4075 }
0x12d0   :  { %v4080_v52 = vmul.f32 0.03125, %v4076_v51 }
0x12d2   :  { %v4082_v53 = vadd.f32 1e-12, %v4080_v52 }
0x12d3   :  { %v4079_v19 = vpop.xlane.xlu0 %4078 }
0x12d4   :  { %5269 = vrsqrt.f32 %v4082_v53  ;;  %v4081_v46 = vmul.f32 0.03125, %v4079_v19 }
0x12d6   :  { %v4083_v14 = vadd.f32 1e-12, %v4081_v46 }
0x12d8   :  { %5271 = vrsqrt.f32 %v4083_v14 }
0x12de   :  { %v5270_v18 = vpop.eup %5269 }
0x12df   :  { %v4086_v54 = vmul.f32 %v5270_v18, %v4070_v49 }
0x12e1   :  { %v4094_v57 = vmul.f32 %v4624_v23, %v4086_v54 }
0x12e2   :  { %v5272_v58 = vpop.eup %5271 }
0x12e3   :  { %v4087_v59 = vmul.f32 %v5272_v58, %v4071_v61  ;;  %v6308_v60 = vadd.f32 %v4625_v55, %v4094_v57 }
0x12e5   :  { %v4095_v62 = vmul.f32 %v4624_v23, %v4087_v59  ;;  %5047 = vmatprep.mubr.msk.f32.mxu1 %vm166_vm0, %v6308_v60 }
0x12e7   :  { %v6312_v5 = vadd.f32 %v4625_v55, %v4095_v62 }
0x12e9   :  { %5048 = vmatmul.mubr.msk.f32.vlgmr.msra.gmra.mrb[38].mxu1 %vm166_vm0, %v6312_v5 }
0x12ea   :  { %5131 = vmatpush3.bf16.msra.mxu1 %v5128_v9 }
0x12eb   :  { %5133 = vmatprep.subr.bf16.mxu1 %v5132_v13 }
0x12ee   :  { %5135 = vmatpush3.bf16.msra.mxu1 %v5132_v13 }
0x12ef   :  { %5137 = vmatprep.subr.bf16.mxu1 %v5136_v22 }
0x12f2   :  { %5139 = vmatpush3.bf16.msra.mxu1 %v5136_v22 }
0x12f3   :  { %5141 = vmatprep.subr.bf16.mxu1 %v5140_v25 }
0x12f6   :  { %5143 = vmatpush3.bf16.msra.mxu1 %v5140_v25 }
0x13bc   :  { %v5049_v21 = vpop.f32.mrb[38].mxu1 }
0x13bd   :  { %v4195_v15 = vadd.f32 %v5049_v21, %v4627_v26  ;;  %v4189_v27 = vpop.f32.mrb[39].mxu1 }
0x13be   :  { %v4190_v28 = vadd.f32 %v4627_v26, %v4189_v27 }
0x13bf   :  { %v4201_v29 = vmul.f32 0.70710677, %v4195_v15  ;;  %v4199_v10 = vmul.f32 0.5, %v4195_v15 }
0x13c0   :  { %v4200_v30 = vmul.f32 0.70710677, %v4190_v28  ;;  %v4198_v8 = vmul.f32 0.5, %v4190_v28 }
0x13c1   :  { %v4207_v31 = vand.u32 2147483647, %v4201_v29  ;;  %vm4203_vm6 = vcmp.ge.f32.partialorder %v4201_v29, 0.0 }
0x13c2   :  { %v4206_v32 = vand.u32 2147483647, %v4200_v30  ;;  %vm4202_vm7 = vcmp.ge.f32.partialorder %v4200_v30, 0.0  ;;  %v4205_v55 = vsel %vm4203_vm6, 1.0, %v5517_v7 }
0x13c3   :  { %v4209_v34 = vmul.f32 0.3275911, %v4207_v31  ;;  %v4235_v47 = vsub.f32 0.0, %v4207_v31  ;;  %v4204_v59 = vsel %vm4202_vm7, 1.0, %v5517_v7 }
0x13c4   :  { %v4208_v36 = vmul.f32 0.3275911, %v4206_v32  ;;  %v4234_v35 = vsub.f32 0.0, %v4206_v32 }
0x13c5   :  { %v4211_v38 = vadd.f32 1.0, %v4209_v34  ;;  %v4237_v1 = vmul.f32 %v4235_v47, %v4207_v31  ;;  %v4402_v47 = vld [vmem:[%s6424_s16 + $0x10] sm:$0xff] }
0x13c6   :  { %v4210_v40 = vadd.f32 1.0, %v4208_v36  ;;  %v4236_v56 = vmul.f32 %v4234_v35, %v4206_v32  ;;  %v4403_v35 = vld [vmem:[%s6424_s16 + $0x18] sm:$0xff] }
0x13c7   :  { %5273 = vrcp.f32 %v4211_v38  ;;  %v4240_v45 = vmul.f32 1.442695, %v4237_v1  ;;  %v4401_v38 = vld [vmem:[%s6424_s16 + $0x8] sm:$0xff] }
0x13c8   :  { %5275 = vrcp.f32 %v4210_v40  ;;  %v4238_v39 = vmul.f32 1.442695, %v4236_v56 }
0x13c9   :  { %5277 = vpow2.f32 %v4240_v45 }
0x13ca   :  { %5279 = vpow2.f32 %v4238_v39 }
0x13d1   :  { %v5274_v17 = vpop.eup %5273 }
0x13d2   :  { %v5276_v16 = vpop.eup %5275  ;;  %v4217_v63 = vmul.f32 1.0614054, %v5274_v17 }
0x13d3   :  { %v4216_v33 = vmul.f32 1.0614054, %v5276_v16  ;;  %v5278_v19 = vpop.eup %5277 }
0x13d4   :  { %v4219_v48 = vadd.f32 -1.4531521, %v4217_v63  ;;  %v5280_v14 = vpop.eup %5279 }
0x13d5   :  { %v4218_v61 = vadd.f32 -1.4531521, %v4216_v33 }
0x13d6   :  { %v4221_v49 = vmul.f32 %v5274_v17, %v4219_v48 }
0x13d7   :  { %v4220_v2 = vmul.f32 %v5276_v16, %v4218_v61  ;;  %v4644_v61 = vld [vmem:[%s6422_s14 + $0x1] ss:$0 sm:$0xff]  ;;  %s5518_s14 = smov [#allocation14]  }
0x13d8   :  { %v4223_v50 = vadd.f32 1.4214138, %v4221_v49  ;;  %s4502_s22 = sshll.u32 %s5518_s14, 4  ;;  %s4503_s22 = int_to_ptr.vmem [resolvable:$true] %s4502_s22 }
0x13d9   :  { %v4222_v3 = vadd.f32 1.4214138, %v4220_v2  ;;  %v4645_v2 = vld [vmem:[%s6423_s15 + $0x1] ss:$0 sm:$0xff]  ;;  %s5443_s23 = scalar_lea.vmem %s4503_s22, 256  ;;  %p5448_p1 = scmp.lt.s32.totalorder %s4503_s22, %s4503_s22 }
0x13da   :  { %v4225_v0 = vmul.f32 %v5274_v17, %v4223_v50  ;;  %p5444_p0 = scmp.ne.s32.totalorder %s4503_s22, %s5443_s23  ;;  %p5449_p2 = scmp.lt.s32.totalorder %s5443_s23, %s5443_s23 }
0x13db   :  { %v4224_v41 = vmul.f32 %v5276_v16, %v4222_v3 }
0x13dc   :  { %v4227_v43 = vadd.f32 -0.28449672, %v4225_v0  ;;  %p5450_p3 = por %p5449_p2, %p5448_p1 }
0x13dd   :  { %v4226_v4 = vadd.f32 -0.28449672, %v4224_v41 }
0x13de   :  { %v4229_v42 = vmul.f32 %v5274_v17, %v4227_v43  ;;  %p5451_p4 = pnand %p5450_p3, %p5444_p0 }
0x13df   :  { %v4228_v11 = vmul.f32 %v5276_v16, %v4226_v4 }
0x13e0   :  { %v4231_v51 = vadd.f32 0.2548296, %v4229_v42 }
0x13e1   :  { %v4230_v52 = vadd.f32 0.2548296, %v4228_v11 }
0x13e2   :  { %v4233_v53 = vmul.f32 %v5274_v17, %v4231_v51  ;;  %v5148_v17 = vpack.c.bf16 %v4403_v35, %v4402_v47 }
0x13e3   :  { %v4232_v46 = vmul.f32 %v5276_v16, %v4230_v52 }
0x13e4   :  { %v4243_v18 = vmul.f32 %v5278_v19, %v4233_v53 }
0x13e5   :  { %v4242_v23 = vmul.f32 %v5280_v14, %v4232_v46 }
0x13e6   :  { %v4245_v54 = vsub.f32 1.0, %v4243_v18 }
0x13e7   :  { %v4244_v57 = vsub.f32 1.0, %v4242_v23 }
0x13e8   :  { %v4247_v58 = vmul.f32 %v4245_v54, %v4205_v55 }
0x13e9   :  { %v4246_v62 = vmul.f32 %v4244_v57, %v4204_v59 }
0x13ea   :  { %v4249_v6 = vadd.f32 1.0, %v4247_v58 }
0x13eb   :  { %v4248_v9 = vadd.f32 1.0, %v4246_v62 }
0x13ec   :  { %v4251_v13 = vmul.f32 %v4249_v6, %v4199_v10 }
0x13ed   :  { %v4250_v12 = vmul.f32 %v4248_v9, %v4198_v8 }
0x13ef   :  { %5066 = vmatprep.mubr.msk.f32.mxu1 %vm2171_vm5, %v4250_v12 }
0x13f0   :  { %5067 = vmatmul.mubr.msk.f32.vlgmr.msra.gmra.mrb[40].mxu1 %vm2171_vm5, %v4251_v13 }
0x14c3   :  { %v5068_v20 = vpop.f32.mrb[40].mxu1 }
0x14c4   :  { %v4347_v22 = vadd.f32 %v5068_v20, %v4639_v44  ;;  %v4341_v37 = vpop.f32.mrb[41].mxu1 }
0x14c5   :  { %v4342_v24 = vadd.f32 %v4639_v44, %v4341_v37 }
0x14c6   :  { %v4351_v7 = vadd.f32 %v4347_v22, %v6312_v5 }
0x14c7   :  { %v4350_v25 = vadd.f32 %v4342_v24, %v6308_v60  ;;  %v4400_v60 = vld [vmem:[%s6424_s16] sm:$0xff] }
0x14c8   :  { %v4359_v26 = vsel %vm166_vm0, %v4351_v7, 0.0  ;;  %v5144_v40 = vpack.c.bf16 %v4401_v38, %v4400_v60 }
0x14c9   :  { %4360 = vadd.xlane.f32.xlu1 %v4359_v26  ;;  %v4356_v21 = vsel %vm166_vm0, %v4350_v25, 0.0 }
0x14ca   :  { %4357 = vadd.xlane.f32.xlu0 %v4356_v21  ;;  %5145 = vmatprep.subr.bf16.mxu0 %v5144_v40 }
0x14cb   :  { %5147 = vmatpush3.bf16.msra.mxu0 %v5144_v40 }
0x14cc   :  { %5149 = vmatprep.subr.bf16.mxu0 %v5148_v17 }
0x14cf   :  { %5151 = vmatpush3.bf16.msra.mxu0 %v5148_v17 }
0x1556   :  { %v4361_v15 = vpop.xlane.xlu1 %4360 }
0x1557   :  { %v4363_v27 = vmul.f32 0.03125, %v4361_v15  ;;  %v4358_v28 = vpop.xlane.xlu0 %4357 }
0x1558   :  { %v4362_v29 = vmul.f32 0.03125, %v4358_v28 }
0x1559   :  { %v4365_v30 = vsub.f32 %v4351_v7, %v4363_v27 }
0x155a   :  { %v4364_v31 = vsub.f32 %v4350_v25, %v4362_v29 }
0x155b   :  { %v4367_v32 = vmul.f32 %v4365_v30, %v4365_v30 }
0x155c   :  { %v4366_v34 = vmul.f32 %v4364_v31, %v4364_v31 }
0x155d   :  { %v4371_v36 = vsel %vm166_vm0, %v4367_v32, 0.0 }
0x155e   :  { %4372 = vadd.xlane.f32.xlu1 %v4371_v36  ;;  %v4368_v5 = vsel %vm166_vm0, %v4366_v34, 0.0 }
0x155f   :  { %4369 = vadd.xlane.f32.xlu0 %v4368_v5 }
0x15eb   :  { %v4373_v1 = vpop.xlane.xlu1 %4372 }
0x15ec   :  { %v4375_v16 = vmul.f32 0.03125, %v4373_v1  ;;  %v4370_v63 = vpop.xlane.xlu0 %4369 }
0x15ed   :  { %v4374_v56 = vmul.f32 0.03125, %v4370_v63 }
0x15ee   :  { %v4377_v33 = vadd.f32 1e-12, %v4375_v16 }
0x15ef   :  { %v4376_v48 = vadd.f32 1e-12, %v4374_v56 }
0x15f0   :  { %5281 = vrsqrt.f32 %v4377_v33 }
0x15f1   :  { %5283 = vrsqrt.f32 %v4376_v48 }
0x15fa   :  { %v5282_v45 = vpop.eup %5281 }
0x15fb   :  { %v5284_v49 = vpop.eup %5283  ;;  %v4381_v39 = vmul.f32 %v5282_v45, %v4365_v30 }
0x15fc   :  { %v4380_v50 = vmul.f32 %v5284_v49, %v4364_v31 }
0x15fd   :  { %v4389_v3 = vmul.f32 %v4644_v61, %v4381_v39 }
0x15fe   :  { %v4388_v0 = vmul.f32 %v4644_v61, %v4380_v50 }
0x15ff   :  { %v4397_v41 = vadd.f32 %v4645_v2, %v4389_v3 }
0x1600   :  { %v4396_v43 = vadd.f32 %v4645_v2, %v4388_v0 }
0x1601   :  { %4399 = vst.msk [vmem:[#allocation14 + $0x8] sm:$0xff] %vm166_vm0, %v4397_v41 }
0x1602   :  { %5077 = vmatprep.mubr.msk.f32.mxu0 %vm166_vm0, %v4396_v43  ;;  %4398 = vst.msk [vmem:[#allocation14] sm:$0xff] %vm166_vm0, %v4396_v43 }
0x1603   :  { %5078 = vmatmul.mubr.msk.f32.vlgmr.msra.gmra.mrb[38].mxu0 %vm166_vm0, %v4397_v41 }
0x1604   :  { %5454 = shalt.err (!%p5451_p4)
}
0x1605   :  { %s5455_s29 = scalar_lea.hbm %s6426_s18, 256 }
0x1606   :  { %p5456_p5 = scmp.ne.s32.totalorder %s6426_s18, %s5455_s29  ;;  %p5459_p6 = scmp.lt.u32.totalorder %s5455_s29, %s6426_s18 }
0x1608   :  { %p5461_p7 = pnand %p5459_p6, %p5456_p5 }
0x160a   :  { %5464 = shalt.err (!%p5461_p7)
}
0x160b   :  { %4508 = dma.vmem_to_hbm [thread:$0]  %s4503_s22, 256, %s6426_s18, [#allocation4], %s5505_s9, %s5505_s9, %s5506_s0   ;;  %vm4494_vm8 = vcmask 253952  }
0x160c   :  { %v4646_v4 = vld [vmem:[%s6425_s17] ss:$0 sm:$0xff]  ;;  %s5519_s12 = smov [#allocation15]  }
0x160d   :  { %s4515_s13 = sshll.u32 %s5519_s12, 4  ;;  %s4516_s13 = int_to_ptr.vmem [resolvable:$true] %s4515_s13 }
0x160e   :  { %s5465_s8 = scalar_lea.vmem %s4516_s13, 32  ;;  %p5470_p9 = scmp.lt.s32.totalorder %s4516_s13, %s4516_s13 }
0x160f   :  { %p5466_p8 = scmp.ne.s32.totalorder %s4516_s13, %s5465_s8  ;;  %p5471_p10 = scmp.lt.s32.totalorder %s5465_s8, %s5465_s8 }
0x1611   :  { %p5472_p11 = por %p5471_p10, %p5470_p9 }
0x1613   :  { %p5473_p12 = pnand %p5472_p11, %p5466_p8 }
0x16d6   :  { %v5079_v42 = vpop.f32.mrb[38].mxu0 }
0x16d7   :  { %v4489_v11 = vadd.f32 %v5079_v42, %v4646_v4  ;;  %v4483_v51 = vpop.f32.mrb[39].mxu0 }
0x16d8   :  { %v4484_v52 = vadd.f32 %v4646_v4, %v4483_v51 }
0x16d9   :  { %5285 = vtanh.f32 %v4489_v11 }
0x16da   :  { %5287 = vtanh.f32 %v4484_v52 }
0x16e3   :  { %v5286_v53 = vpop.eup %5285 }
0x16e4   :  { %v5288_v19 = vpop.eup %5287  ;;  %4496 = vst.msk [vmem:[#allocation15 + $0x1] sm:$0x1] %vm4494_vm8, %v5286_v53 }
0x16e5   :  { %4495 = vst.msk [vmem:[#allocation15] sm:$0x1] %vm4494_vm8, %v5288_v19 }
0x16e6   :  { %5476 = shalt.err (!%p5473_p12)
}
0x16e7   :  { %s6446_s9 = sld [smem:[#allocation27_spill]] }
0x16ed   :  { %s5477_s0 = scalar_lea.hbm %s6446_s9, 32 }
0x16ee   :  { %p5478_p13 = scmp.ne.s32.totalorder %s6446_s9, %s5477_s0  ;;  %p5481_p0 = scmp.lt.u32.totalorder %s5477_s0, %s6446_s9 }
0x16f0   :  { %p5483_p1 = pnand %p5481_p0, %p5478_p13 }
0x16f2   :  { %5486 = shalt.err (!%p5483_p1)
}
0x16f3   :  { %4518 = dma.vmem_to_hbm [thread:$0]  %s4516_s13, 32, %s6446_s9, [#allocation16]  }
0x16f4   :  { %5495 = dma.done.wait [#allocation4], 256  }
0x16f5   :  { %5496 = vsyncadd [#allocation4], 4294967040 }
0x16f6   :  { %5497 = dma.done.wait [#allocation16], 32  }
0x16f7   :  { %5498 = vsyncadd [#allocation16], 4294967264 }
0x16f8   :  { %4525 = vsyncpa [#allocation3], 1 }
0x16f9   :  { %4526 = vsyncpa [#allocation6], 1 }
0x16fa   :  { %4527 = vsyncpa [#allocation9], 1 }
0x16fb   :  { %4528 = vsyncpa [#allocation12], 1 }
0x16fc   :  { %4529 = vsyncpa [#allocation4], 1 }
0x16fd   :  { %4530 = vsyncpa [#allocation16], 1 }

</bundles_post_ra>
